<compile_context>
chip_gen: v5e
topology: v5e:2x2
jax: 0.10.0
libtpu: 0.0.40
codegen_flags: <defaults>
</compile_context>

<pallas_src>
import functools

import jax
import jax.numpy as jnp
from jax.experimental import pallas as pl
from jax.experimental.pallas import tpu as pltpu

EPS = 1e-5
LANE = 128
TM_CONV = 512   # max row-tile for the conv blocks
TM_FC = 256     # max row-tile for the fused FC stack
VMEM_LIMIT = 32 * 1024 * 1024  # explicit, safe on v5e/v6e/v7x


def _round_up(a, b):
    return (a + b - 1) // b * b


# ----------------------------- Pallas kernels -----------------------------

def _conv_pool_kernel(p0_ref, p1_ref, p2_ref, p3_ref, w_ref, shift_ref, o_ref):
    """Fused Conv(as matmul) + BN/bias(folded) + ReLU + MaxPool2x2.

    p{0..3}: im2col patches of the four 2x2 pooling-window corners, (tm, Kpad) bf16.
    w:       folded weight (Kpad, 128) bf16.   shift: (1, 128) f32.
    o = relu(max_i(p_i @ w) + shift)   (ReLU is monotone, shift is per-channel,
    so pooling before the affine+ReLU is exact).
    """
    w = w_ref[...]
    a = jnp.dot(p0_ref[...], w, preferred_element_type=jnp.float32)
    a = jnp.maximum(a, jnp.dot(p1_ref[...], w, preferred_element_type=jnp.float32))
    a = jnp.maximum(a, jnp.dot(p2_ref[...], w, preferred_element_type=jnp.float32))
    a = jnp.maximum(a, jnp.dot(p3_ref[...], w, preferred_element_type=jnp.float32))
    o_ref[...] = jnp.maximum(a + shift_ref[...], 0.0).astype(o_ref.dtype)


def _fc_stack_kernel(x_ref, w1_ref, s1_ref, w2_ref, s2_ref, w3_ref, s3_ref, o_ref):
    """Fused fc1+BN+ReLU -> fc2+BN+ReLU -> fc3 (+bias), all weights resident."""
    h = jnp.dot(x_ref[...], w1_ref[...], preferred_element_type=jnp.float32)
    h = jnp.maximum(h + s1_ref[...], 0.0)
    h = jnp.dot(h.astype(w2_ref.dtype), w2_ref[...], preferred_element_type=jnp.float32)
    h = jnp.maximum(h + s2_ref[...], 0.0)
    h = jnp.dot(h.astype(w3_ref.dtype), w3_ref[...], preferred_element_type=jnp.float32)
    o_ref[...] = (h + s3_ref[...]).astype(o_ref.dtype)


# ------------------------------ wrappers -----------------------------------

def _im2col_pool_corners(x_nhwc, k, k_pad):
    """NHWC -> 4 corner patch matrices (N*Hp*Wp, k_pad) for fused conv+pool.

    Patch column order is (kh, kw, cin), matching the prepared weight layout.
    """
    n, h, w, c = x_nhwc.shape
    ho, wo = h - k + 1, w - k + 1
    cols = [x_nhwc[:, kh:kh + ho, kw:kw + wo, :] for kh in range(k) for kw in range(k)]
    patches = jnp.stack(cols, axis=3).reshape(n, ho, wo, k * k * c)
    if k * k * c < k_pad:
        patches = jnp.pad(patches, ((0, 0), (0, 0), (0, 0), (0, k_pad - k * k * c)))
    hp, wp = ho // 2, wo // 2
    corners = [patches[:, dh::2, dw::2, :].reshape(n * hp * wp, k_pad)
               for dh in range(2) for dw in range(2)]
    return corners, (n, hp, wp)


def conv_block(x_nhwc, w_pad, shift_pad, *, k, k_pad):
    """Conv2d(valid, k) + BN(eval) + ReLU + MaxPool2d(2,2), NHWC in/out (bf16).

    Output channels are lane-padded to 128 (padding channels are exactly 0).
    """
    corners, (n, hp, wp) = _im2col_pool_corners(x_nhwc, k, k_pad)
    m = n * hp * wp
    tm = min(TM_CONV, _round_up(m, 8))
    m_pad = _round_up(m, tm)
    if m_pad != m:
        corners = [jnp.pad(c, ((0, m_pad - m), (0, 0))) for c in corners]

    out = pl.pallas_call(
        _conv_pool_kernel,
        out_shape=jax.ShapeDtypeStruct((m_pad, LANE), jnp.bfloat16),
        grid_spec=pltpu.PrefetchScalarGridSpec(
            num_scalar_prefetch=0,
            grid=(m_pad // tm,),
            in_specs=[pl.BlockSpec((tm, k_pad), lambda i: (i, 0))] * 4
                     + [pl.BlockSpec((k_pad, LANE), lambda i: (0, 0)),
                        pl.BlockSpec((1, LANE), lambda i: (0, 0))],
            out_specs=pl.BlockSpec((tm, LANE), lambda i: (i, 0)),
        ),
        compiler_params=pltpu.CompilerParams(
            dimension_semantics=("parallel",),
            vmem_limit_bytes=VMEM_LIMIT,
        ),
    )(*corners, w_pad, shift_pad)
    return out[:m].reshape(n, hp, wp, LANE)


def fc_stack(x, w1, s1, w2, s2, w3, s3):
    """Fused fc1/fc2/fc3 stack. x: (batch, K1) bf16, weights 128-padded bf16."""
    m, k1 = x.shape
    tm = min(TM_FC, _round_up(m, 8))
    m_pad = _round_up(m, tm)
    if m_pad != m:
        x = jnp.pad(x, ((0, m_pad - m), (0, 0)))

    out = pl.pallas_call(
        _fc_stack_kernel,
        out_shape=jax.ShapeDtypeStruct((m_pad, LANE), jnp.float32),
        grid_spec=pltpu.PrefetchScalarGridSpec(
            num_scalar_prefetch=0,
            grid=(m_pad // tm,),
            in_specs=[pl.BlockSpec((tm, k1), lambda i: (i, 0)),
                      pl.BlockSpec((k1, LANE), lambda i: (0, 0)),
                      pl.BlockSpec((1, LANE), lambda i: (0, 0)),
                      pl.BlockSpec((LANE, LANE), lambda i: (0, 0)),
                      pl.BlockSpec((1, LANE), lambda i: (0, 0)),
                      pl.BlockSpec((LANE, LANE), lambda i: (0, 0)),
                      pl.BlockSpec((1, LANE), lambda i: (0, 0))],
            out_specs=pl.BlockSpec((tm, LANE), lambda i: (i, 0)),
        ),
        compiler_params=pltpu.CompilerParams(
            dimension_semantics=("parallel",),
            vmem_limit_bytes=VMEM_LIMIT,
        ),
    )(x, w1, s1, w2, s2, w3, s3)
    return out[:m]


# --------------------------- parameter preparation --------------------------

def _bn_fold(gamma, beta, mean, var):
    scale = gamma / jnp.sqrt(var + EPS)
    shift = beta - mean * scale
    return scale, shift


def prepare_params(p):
    """One-time (outside the hot path) fold of BN+bias into weights, layout
    permutation to (kh,kw,cin)->cout / NHWC order, bf16 cast, and 128-padding."""
    fp = {}

    def pad2(a, rows, cols):
        return jnp.pad(a, ((0, rows - a.shape[0]), (0, cols - a.shape[1])))

    def pad_shift(v):
        return jnp.pad(v, (0, LANE - v.shape[0])).reshape(1, LANE).astype(jnp.float32)

    # ---- conv1: Conv2d(3, 6, 5) + BN2d(6) ----
    s, t = _bn_fold(p["bn1_g"], p["bn1_b"], p["bn1_m"], p["bn1_v"])
    w = (p["w1"] * s[:, None, None, None]).transpose(2, 3, 1, 0).reshape(75, 6)
    fp["cw1"] = pad2(w, 128, LANE).astype(jnp.bfloat16)          # (128, 128)
    fp["cs1"] = pad_shift(t + p["b1"] * s)

    # ---- conv2: Conv2d(6, 16, 5) + BN2d(16) ----
    s, t = _bn_fold(p["bn2_g"], p["bn2_b"], p["bn2_m"], p["bn2_v"])
    w = (p["w2"] * s[:, None, None, None]).transpose(2, 3, 1, 0).reshape(150, 16)
    fp["cw2"] = pad2(w, 256, LANE).astype(jnp.bfloat16)          # (256, 128)
    fp["cs2"] = pad_shift(t + p["b2"] * s)

    # ---- fc1: Linear(400, 120) + BN1d(120) ----
    # Bake the PyTorch NCHW flatten order into the weight: activation arrives
    # as (hp, wp, c_padded128) flattened, so permute (out, c, h, w) -> (h, w, c, out)
    # and pad c 16->128, out 120->128.
    s, t = _bn_fold(p["bn3_g"], p["bn3_b"], p["bn3_m"], p["bn3_v"])
    w = (p["fw1"] * s[:, None]).reshape(120, 16, 5, 5).transpose(2, 3, 1, 0)
    w = jnp.pad(w, ((0, 0), (0, 0), (0, LANE - 16), (0, LANE - 120)))
    fp["fw1"] = w.reshape(5 * 5 * LANE, LANE).astype(jnp.bfloat16)   # (3200, 128)
    fp["fs1"] = pad_shift(t + p["fb1"] * s)

    # ---- fc2: Linear(120, 84) + BN1d(84) ----
    s, t = _bn_fold(p["bn4_g"], p["bn4_b"], p["bn4_m"], p["bn4_v"])
    w = (p["fw2"] * s[:, None]).T                                # (120, 84)
    fp["fw2"] = pad2(w, LANE, LANE).astype(jnp.bfloat16)
    fp["fs2"] = pad_shift(t + p["fb2"] * s)

    # ---- fc3: Linear(84, 10) ----
    fp["fw3"] = pad2(p["fw3"].T, LANE, LANE).astype(jnp.bfloat16)
    fp["fs3"] = pad_shift(p["fb3"])
    return fp


# ------------------------------ model --------------------------------------

def init_params(key):
    ks = jax.random.split(key, 10)

    def rnd(k, shape, s=0.05):
        return (s * jax.random.normal(k, shape)).astype(jnp.float32)

    return {
        # conv1: Conv2d(3, 6, 5) + BN2d(6)
        "w1": rnd(ks[0], (6, 3, 5, 5)), "b1": rnd(ks[1], (6,)),
        "bn1_g": jnp.ones((6,), jnp.float32), "bn1_b": jnp.zeros((6,), jnp.float32),
        "bn1_m": jnp.zeros((6,), jnp.float32), "bn1_v": jnp.ones((6,), jnp.float32),
        # conv2: Conv2d(6, 16, 5) + BN2d(16)
        "w2": rnd(ks[2], (16, 6, 5, 5)), "b2": rnd(ks[3], (16,)),
        "bn2_g": jnp.ones((16,), jnp.float32), "bn2_b": jnp.zeros((16,), jnp.float32),
        "bn2_m": jnp.zeros((16,), jnp.float32), "bn2_v": jnp.ones((16,), jnp.float32),
        # fc1: Linear(400, 120) + BN1d(120)   (PyTorch weight layout: (out, in))
        "fw1": rnd(ks[4], (120, 400)), "fb1": rnd(ks[5], (120,)),
        "bn3_g": jnp.ones((120,), jnp.float32), "bn3_b": jnp.zeros((120,), jnp.float32),
        "bn3_m": jnp.zeros((120,), jnp.float32), "bn3_v": jnp.ones((120,), jnp.float32),
        # fc2: Linear(120, 84) + BN1d(84)
        "fw2": rnd(ks[6], (84, 120)), "fb2": rnd(ks[7], (84,)),
        "bn4_g": jnp.ones((84,), jnp.float32), "bn4_b": jnp.zeros((84,), jnp.float32),
        "bn4_m": jnp.zeros((84,), jnp.float32), "bn4_v": jnp.ones((84,), jnp.float32),
        # fc3: Linear(84, 10)
        "fw3": rnd(ks[8], (10, 84)), "fb3": rnd(ks[9], (10,)),
    }


def lenet5_vgg_forward(fp, x):
    """x: (N, 3, 32, 32) f32 (NCHW, like PyTorch) -> logits (N, 10) f32."""
    x = x.transpose(0, 2, 3, 1).astype(jnp.bfloat16)              # NHWC, bf16
    # conv block 1: 32x32 -> 28x28 -> pool -> (N, 14, 14, 128pad)
    h = conv_block(x, fp["cw1"], fp["cs1"], k=5, k_pad=128)
    # conv block 2: take the 6 real channels; 14x14 -> 10x10 -> pool -> (N, 5, 5, 128pad)
    h = conv_block(h[..., :6], fp["cw2"], fp["cs2"], k=5, k_pad=256)
    # Flatten (padded channels are exact zeros; NCHW order is baked into fw1).
    # Dropout(0.1) is identity in eval.
    n = h.shape[0]
    h = h.reshape(n, 5 * 5 * LANE)
    logits = fc_stack(h, fp["fw1"], fp["fs1"], fp["fw2"], fp["fs2"],
                      fp["fw3"], fp["fs3"])
    return logits[:, :10]


if __name__ == "__main__":
    key = jax.random.PRNGKey(0)
    k_x, k_p = jax.random.split(key)

    # Input spatial size is forced to 32x32 by the Linear(16*5*5, 120) layer.
    batch = 2
    x = jax.random.normal(k_x, (batch, 3, 32, 32), dtype=jnp.float32)
    params = init_params(k_p)
    fparams = prepare_params(params)   # one-time fold / pad / permute

    logits = jax.jit(lenet5_vgg_forward)(fparams, x)
    logits = jax.block_until_ready(logits)
    assert logits.shape == (batch, 10), logits.shape
    assert bool(jnp.all(jnp.isfinite(logits)))
    print("KERNEL_OK")
</pallas_src>

<mosaic_0001>
module attributes {stable_mosaic.version = 11 : i64} {
  func.func @_conv_pool_kernel(%arg0: i32, %arg1: memref<392x128xbf16, #tpu.memory_space<vmem>>, %arg2: memref<392x128xbf16, #tpu.memory_space<vmem>>, %arg3: memref<392x128xbf16, #tpu.memory_space<vmem>>, %arg4: memref<392x128xbf16, #tpu.memory_space<vmem>>, %arg5: memref<128x128xbf16, #tpu.memory_space<vmem>>, %arg6: memref<1x128xf32, #tpu.memory_space<vmem>>, %arg7: memref<392x128xbf16, #tpu.memory_space<vmem>>) attributes {dimension_semantics = [#tpu.dimension_semantics<parallel>], iteration_bounds = array<i64: 1>, scalar_prefetch = 0 : i64, scratch_operands = 0 : i64, tpu.core_type = #tpu.core_type<tc>, window_params = [{transform_indices = @transform_0, window_bounds = array<i64: 392, 128>}, {transform_indices = @transform_1, window_bounds = array<i64: 392, 128>}, {transform_indices = @transform_2, window_bounds = array<i64: 392, 128>}, {transform_indices = @transform_3, window_bounds = array<i64: 392, 128>}, {pipeline_mode = #tpu.pipeline_mode<synchronous>, transform_indices = @transform_4, window_bounds = array<i64: 128, 128>}, {pipeline_mode = #tpu.pipeline_mode<synchronous>, transform_indices = @transform_5, window_bounds = array<i64: 1, 128>}, {transform_indices = @transform_6, window_bounds = array<i64: 392, 128>}]} {
    %c0 = arith.constant 0 : index
    %c0_0 = arith.constant 0 : index
    %0 = vector.load %arg5[%c0, %c0_0] : memref<128x128xbf16, #tpu.memory_space<vmem>>, vector<128x128xbf16>
    %c0_1 = arith.constant 0 : index
    %c0_2 = arith.constant 0 : index
    %1 = vector.load %arg1[%c0_1, %c0_2] : memref<392x128xbf16, #tpu.memory_space<vmem>>, vector<392x128xbf16>
    %cst = arith.constant dense<0.000000e+00> : vector<392x128xf32>
    %2 = tpu.matmul %1, %0, %cst {dimension_numbers = #tpu.dot_dimension_numbers<[1], [0], [0], [1], [0, 0, 1, 1], [], []>} : vector<392x128xbf16>, vector<128x128xbf16>, vector<392x128xf32> -> vector<392x128xf32>
    %c0_3 = arith.constant 0 : index
    %c0_4 = arith.constant 0 : index
    %3 = vector.load %arg2[%c0_3, %c0_4] : memref<392x128xbf16, #tpu.memory_space<vmem>>, vector<392x128xbf16>
    %cst_5 = arith.constant dense<0.000000e+00> : vector<392x128xf32>
    %4 = tpu.matmul %3, %0, %cst_5 {dimension_numbers = #tpu.dot_dimension_numbers<[1], [0], [0], [1], [0, 0, 1, 1], [], []>} : vector<392x128xbf16>, vector<128x128xbf16>, vector<392x128xf32> -> vector<392x128xf32>
    %5 = arith.maximumf %2, %4 : vector<392x128xf32>
    %c0_6 = arith.constant 0 : index
    %c0_7 = arith.constant 0 : index
    %6 = vector.load %arg3[%c0_6, %c0_7] : memref<392x128xbf16, #tpu.memory_space<vmem>>, vector<392x128xbf16>
    %cst_8 = arith.constant dense<0.000000e+00> : vector<392x128xf32>
    %7 = tpu.matmul %6, %0, %cst_8 {dimension_numbers = #tpu.dot_dimension_numbers<[1], [0], [0], [1], [0, 0, 1, 1], [], []>} : vector<392x128xbf16>, vector<128x128xbf16>, vector<392x128xf32> -> vector<392x128xf32>
    %8 = arith.maximumf %5, %7 : vector<392x128xf32>
    %c0_9 = arith.constant 0 : index
    %c0_10 = arith.constant 0 : index
    %9 = vector.load %arg4[%c0_9, %c0_10] : memref<392x128xbf16, #tpu.memory_space<vmem>>, vector<392x128xbf16>
    %cst_11 = arith.constant dense<0.000000e+00> : vector<392x128xf32>
    %10 = tpu.matmul %9, %0, %cst_11 {dimension_numbers = #tpu.dot_dimension_numbers<[1], [0], [0], [1], [0, 0, 1, 1], [], []>} : vector<392x128xbf16>, vector<128x128xbf16>, vector<392x128xf32> -> vector<392x128xf32>
    %11 = arith.maximumf %8, %10 : vector<392x128xf32>
    %c0_12 = arith.constant 0 : index
    %c0_13 = arith.constant 0 : index
    %12 = vector.load %arg6[%c0_12, %c0_13] : memref<1x128xf32, #tpu.memory_space<vmem>>, vector<1x128xf32>
    %13 = vector.broadcast %12 : vector<1x128xf32> to vector<392x128xf32>
    %14 = arith.addf %11, %13 : vector<392x128xf32>
    %cst_14 = arith.constant 0.000000e+00 : f32
    %15 = vector.broadcast %cst_14 : f32 to vector<392x128xf32>
    %16 = arith.maximumf %14, %15 : vector<392x128xf32>
    %17 = arith.truncf %16 : vector<392x128xf32> to vector<392x128xbf16>
    %c0_15 = arith.constant 0 : index
    %c0_16 = arith.constant 0 : index
    %18 = vector.load %arg7[%c0_15, %c0_16] : memref<392x128xbf16, #tpu.memory_space<vmem>>, vector<392x128xbf16>
    tpu.vector_store %arg7[%c0_15, %c0_16], %17 {strides = array<i32>} : memref<392x128xbf16, #tpu.memory_space<vmem>>, vector<392x128xbf16>,
    return
  }
  func.func @transform_0(%arg0: i32) -> (i32, i32) {
    %c0_i32 = arith.constant 0 : i32
    %c0_i32_0 = arith.constant 0 : i32
    return %arg0, %c0_i32 : i32, i32
  }
  func.func @transform_1(%arg0: i32) -> (i32, i32) {
    %c0_i32 = arith.constant 0 : i32
    %c0_i32_0 = arith.constant 0 : i32
    return %arg0, %c0_i32 : i32, i32
  }
  func.func @transform_2(%arg0: i32) -> (i32, i32) {
    %c0_i32 = arith.constant 0 : i32
    %c0_i32_0 = arith.constant 0 : i32
    return %arg0, %c0_i32 : i32, i32
  }
  func.func @transform_3(%arg0: i32) -> (i32, i32) {
    %c0_i32 = arith.constant 0 : i32
    %c0_i32_0 = arith.constant 0 : i32
    return %arg0, %c0_i32 : i32, i32
  }
  func.func @transform_4(%arg0: i32) -> (i32, i32) {
    %c0_i32 = arith.constant 0 : i32
    %c0_i32_0 = arith.constant 0 : i32
    %c0_i32_1 = arith.constant 0 : i32
    return %c0_i32, %c0_i32_0 : i32, i32
  }
  func.func @transform_5(%arg0: i32) -> (i32, i32) {
    %c0_i32 = arith.constant 0 : i32
    %c0_i32_0 = arith.constant 0 : i32
    %c0_i32_1 = arith.constant 0 : i32
    return %c0_i32, %c0_i32_0 : i32, i32
  }
  func.func @transform_6(%arg0: i32) -> (i32, i32) {
    %c0_i32 = arith.constant 0 : i32
    %c0_i32_0 = arith.constant 0 : i32
    return %arg0, %c0_i32 : i32, i32
  }
}

module attributes {stable_mosaic.version = 11 : i64} {
  func.func @_conv_pool_kernel(%arg0: i32, %arg1: memref<56x256xbf16, #tpu.memory_space<vmem>>, %arg2: memref<56x256xbf16, #tpu.memory_space<vmem>>, %arg3: memref<56x256xbf16, #tpu.memory_space<vmem>>, %arg4: memref<56x256xbf16, #tpu.memory_space<vmem>>, %arg5: memref<256x128xbf16, #tpu.memory_space<vmem>>, %arg6: memref<1x128xf32, #tpu.memory_space<vmem>>, %arg7: memref<56x128xbf16, #tpu.memory_space<vmem>>) attributes {dimension_semantics = [#tpu.dimension_semantics<parallel>], iteration_bounds = array<i64: 1>, scalar_prefetch = 0 : i64, scratch_operands = 0 : i64, tpu.core_type = #tpu.core_type<tc>, window_params = [{transform_indices = @transform_0, window_bounds = array<i64: 56, 256>}, {transform_indices = @transform_1, window_bounds = array<i64: 56, 256>}, {transform_indices = @transform_2, window_bounds = array<i64: 56, 256>}, {transform_indices = @transform_3, window_bounds = array<i64: 56, 256>}, {pipeline_mode = #tpu.pipeline_mode<synchronous>, transform_indices = @transform_4, window_bounds = array<i64: 256, 128>}, {pipeline_mode = #tpu.pipeline_mode<synchronous>, transform_indices = @transform_5, window_bounds = array<i64: 1, 128>}, {transform_indices = @transform_6, window_bounds = array<i64: 56, 128>}]} {
    %c0 = arith.constant 0 : index
    %c0_0 = arith.constant 0 : index
    %0 = vector.load %arg5[%c0, %c0_0] : memref<256x128xbf16, #tpu.memory_space<vmem>>, vector<256x128xbf16>
    %c0_1 = arith.constant 0 : index
    %c0_2 = arith.constant 0 : index
    %1 = vector.load %arg1[%c0_1, %c0_2] : memref<56x256xbf16, #tpu.memory_space<vmem>>, vector<56x256xbf16>
    %cst = arith.constant dense<0.000000e+00> : vector<56x128xf32>
    %2 = tpu.matmul %1, %0, %cst {dimension_numbers = #tpu.dot_dimension_numbers<[1], [0], [0], [1], [0, 0, 1, 1], [], []>} : vector<56x256xbf16>, vector<256x128xbf16>, vector<56x128xf32> -> vector<56x128xf32>
    %c0_3 = arith.constant 0 : index
    %c0_4 = arith.constant 0 : index
    %3 = vector.load %arg2[%c0_3, %c0_4] : memref<56x256xbf16, #tpu.memory_space<vmem>>, vector<56x256xbf16>
    %cst_5 = arith.constant dense<0.000000e+00> : vector<56x128xf32>
    %4 = tpu.matmul %3, %0, %cst_5 {dimension_numbers = #tpu.dot_dimension_numbers<[1], [0], [0], [1], [0, 0, 1, 1], [], []>} : vector<56x256xbf16>, vector<256x128xbf16>, vector<56x128xf32> -> vector<56x128xf32>
    %5 = arith.maximumf %2, %4 : vector<56x128xf32>
    %c0_6 = arith.constant 0 : index
    %c0_7 = arith.constant 0 : index
    %6 = vector.load %arg3[%c0_6, %c0_7] : memref<56x256xbf16, #tpu.memory_space<vmem>>, vector<56x256xbf16>
    %cst_8 = arith.constant dense<0.000000e+00> : vector<56x128xf32>
    %7 = tpu.matmul %6, %0, %cst_8 {dimension_numbers = #tpu.dot_dimension_numbers<[1], [0], [0], [1], [0, 0, 1, 1], [], []>} : vector<56x256xbf16>, vector<256x128xbf16>, vector<56x128xf32> -> vector<56x128xf32>
    %8 = arith.maximumf %5, %7 : vector<56x128xf32>
    %c0_9 = arith.constant 0 : index
    %c0_10 = arith.constant 0 : index
    %9 = vector.load %arg4[%c0_9, %c0_10] : memref<56x256xbf16, #tpu.memory_space<vmem>>, vector<56x256xbf16>
    %cst_11 = arith.constant dense<0.000000e+00> : vector<56x128xf32>
    %10 = tpu.matmul %9, %0, %cst_11 {dimension_numbers = #tpu.dot_dimension_numbers<[1], [0], [0], [1], [0, 0, 1, 1], [], []>} : vector<56x256xbf16>, vector<256x128xbf16>, vector<56x128xf32> -> vector<56x128xf32>
    %11 = arith.maximumf %8, %10 : vector<56x128xf32>
    %c0_12 = arith.constant 0 : index
    %c0_13 = arith.constant 0 : index
    %12 = vector.load %arg6[%c0_12, %c0_13] : memref<1x128xf32, #tpu.memory_space<vmem>>, vector<1x128xf32>
    %13 = vector.broadcast %12 : vector<1x128xf32> to vector<56x128xf32>
    %14 = arith.addf %11, %13 : vector<56x128xf32>
    %cst_14 = arith.constant 0.000000e+00 : f32
    %15 = vector.broadcast %cst_14 : f32 to vector<56x128xf32>
    %16 = arith.maximumf %14, %15 : vector<56x128xf32>
    %17 = arith.truncf %16 : vector<56x128xf32> to vector<56x128xbf16>
    %c0_15 = arith.constant 0 : index
    %c0_16 = arith.constant 0 : index
    %18 = vector.load %arg7[%c0_15, %c0_16] : memref<56x128xbf16, #tpu.memory_space<vmem>>, vector<56x128xbf16>
    tpu.vector_store %arg7[%c0_15, %c0_16], %17 {strides = array<i32>} : memref<56x128xbf16, #tpu.memory_space<vmem>>, vector<56x128xbf16>,
    return
  }
  func.func @transform_0(%arg0: i32) -> (i32, i32) {
    %c0_i32 = arith.constant 0 : i32
    %c0_i32_0 = arith.constant 0 : i32
    return %arg0, %c0_i32 : i32, i32
  }
  func.func @transform_1(%arg0: i32) -> (i32, i32) {
    %c0_i32 = arith.constant 0 : i32
    %c0_i32_0 = arith.constant 0 : i32
    return %arg0, %c0_i32 : i32, i32
  }
  func.func @transform_2(%arg0: i32) -> (i32, i32) {
    %c0_i32 = arith.constant 0 : i32
    %c0_i32_0 = arith.constant 0 : i32
    return %arg0, %c0_i32 : i32, i32
  }
  func.func @transform_3(%arg0: i32) -> (i32, i32) {
    %c0_i32 = arith.constant 0 : i32
    %c0_i32_0 = arith.constant 0 : i32
    return %arg0, %c0_i32 : i32, i32
  }
  func.func @transform_4(%arg0: i32) -> (i32, i32) {
    %c0_i32 = arith.constant 0 : i32
    %c0_i32_0 = arith.constant 0 : i32
    %c0_i32_1 = arith.constant 0 : i32
    return %c0_i32, %c0_i32_0 : i32, i32
  }
  func.func @transform_5(%arg0: i32) -> (i32, i32) {
    %c0_i32 = arith.constant 0 : i32
    %c0_i32_0 = arith.constant 0 : i32
    %c0_i32_1 = arith.constant 0 : i32
    return %c0_i32, %c0_i32_0 : i32, i32
  }
  func.func @transform_6(%arg0: i32) -> (i32, i32) {
    %c0_i32 = arith.constant 0 : i32
    %c0_i32_0 = arith.constant 0 : i32
    return %arg0, %c0_i32 : i32, i32
  }
}

module attributes {stable_mosaic.version = 11 : i64} {
  func.func @_fc_stack_kernel(%arg0: i32, %arg1: memref<8x3200xbf16, #tpu.memory_space<vmem>>, %arg2: memref<3200x128xbf16, #tpu.memory_space<vmem>>, %arg3: memref<1x128xf32, #tpu.memory_space<vmem>>, %arg4: memref<128x128xbf16, #tpu.memory_space<vmem>>, %arg5: memref<1x128xf32, #tpu.memory_space<vmem>>, %arg6: memref<128x128xbf16, #tpu.memory_space<vmem>>, %arg7: memref<1x128xf32, #tpu.memory_space<vmem>>, %arg8: memref<8x128xf32, #tpu.memory_space<vmem>>) attributes {dimension_semantics = [#tpu.dimension_semantics<parallel>], iteration_bounds = array<i64: 1>, scalar_prefetch = 0 : i64, scratch_operands = 0 : i64, tpu.core_type = #tpu.core_type<tc>, window_params = [{transform_indices = @transform_0, window_bounds = array<i64: 8, 3200>}, {pipeline_mode = #tpu.pipeline_mode<synchronous>, transform_indices = @transform_1, window_bounds = array<i64: 3200, 128>}, {pipeline_mode = #tpu.pipeline_mode<synchronous>, transform_indices = @transform_2, window_bounds = array<i64: 1, 128>}, {pipeline_mode = #tpu.pipeline_mode<synchronous>, transform_indices = @transform_3, window_bounds = array<i64: 128, 128>}, {pipeline_mode = #tpu.pipeline_mode<synchronous>, transform_indices = @transform_4, window_bounds = array<i64: 1, 128>}, {pipeline_mode = #tpu.pipeline_mode<synchronous>, transform_indices = @transform_5, window_bounds = array<i64: 128, 128>}, {pipeline_mode = #tpu.pipeline_mode<synchronous>, transform_indices = @transform_6, window_bounds = array<i64: 1, 128>}, {transform_indices = @transform_7, window_bounds = array<i64: 8, 128>}]} {
    %c0 = arith.constant 0 : index
    %c0_0 = arith.constant 0 : index
    %0 = vector.load %arg1[%c0, %c0_0] : memref<8x3200xbf16, #tpu.memory_space<vmem>>, vector<8x3200xbf16>
    %c0_1 = arith.constant 0 : index
    %c0_2 = arith.constant 0 : index
    %1 = vector.load %arg2[%c0_1, %c0_2] : memref<3200x128xbf16, #tpu.memory_space<vmem>>, vector<3200x128xbf16>
    %cst = arith.constant dense<0.000000e+00> : vector<8x128xf32>
    %2 = tpu.matmul %0, %1, %cst {dimension_numbers = #tpu.dot_dimension_numbers<[1], [0], [0], [1], [0, 0, 1, 1], [], []>} : vector<8x3200xbf16>, vector<3200x128xbf16>, vector<8x128xf32> -> vector<8x128xf32>
    %c0_3 = arith.constant 0 : index
    %c0_4 = arith.constant 0 : index
    %3 = vector.load %arg3[%c0_3, %c0_4] : memref<1x128xf32, #tpu.memory_space<vmem>>, vector<1x128xf32>
    %4 = vector.broadcast %3 : vector<1x128xf32> to vector<8x128xf32>
    %5 = arith.addf %2, %4 : vector<8x128xf32>
    %cst_5 = arith.constant 0.000000e+00 : f32
    %6 = vector.broadcast %cst_5 : f32 to vector<8x128xf32>
    %7 = arith.maximumf %5, %6 : vector<8x128xf32>
    %8 = arith.truncf %7 : vector<8x128xf32> to vector<8x128xbf16>
    %c0_6 = arith.constant 0 : index
    %c0_7 = arith.constant 0 : index
    %9 = vector.load %arg4[%c0_6, %c0_7] : memref<128x128xbf16, #tpu.memory_space<vmem>>, vector<128x128xbf16>
    %cst_8 = arith.constant dense<0.000000e+00> : vector<8x128xf32>
    %10 = tpu.matmul %8, %9, %cst_8 {dimension_numbers = #tpu.dot_dimension_numbers<[1], [0], [0], [1], [0, 0, 1, 1], [], []>} : vector<8x128xbf16>, vector<128x128xbf16>, vector<8x128xf32> -> vector<8x128xf32>
    %c0_9 = arith.constant 0 : index
    %c0_10 = arith.constant 0 : index
    %11 = vector.load %arg5[%c0_9, %c0_10] : memref<1x128xf32, #tpu.memory_space<vmem>>, vector<1x128xf32>
    %12 = vector.broadcast %11 : vector<1x128xf32> to vector<8x128xf32>
    %13 = arith.addf %10, %12 : vector<8x128xf32>
    %cst_11 = arith.constant 0.000000e+00 : f32
    %14 = vector.broadcast %cst_11 : f32 to vector<8x128xf32>
    %15 = arith.maximumf %13, %14 : vector<8x128xf32>
    %16 = arith.truncf %15 : vector<8x128xf32> to vector<8x128xbf16>
    %c0_12 = arith.constant 0 : index
    %c0_13 = arith.constant 0 : index
    %17 = vector.load %arg6[%c0_12, %c0_13] : memref<128x128xbf16, #tpu.memory_space<vmem>>, vector<128x128xbf16>
    %cst_14 = arith.constant dense<0.000000e+00> : vector<8x128xf32>
    %18 = tpu.matmul %16, %17, %cst_14 {dimension_numbers = #tpu.dot_dimension_numbers<[1], [0], [0], [1], [0, 0, 1, 1], [], []>} : vector<8x128xbf16>, vector<128x128xbf16>, vector<8x128xf32> -> vector<8x128xf32>
    %c0_15 = arith.constant 0 : index
    %c0_16 = arith.constant 0 : index
    %19 = vector.load %arg7[%c0_15, %c0_16] : memref<1x128xf32, #tpu.memory_space<vmem>>, vector<1x128xf32>
    %20 = vector.broadcast %19 : vector<1x128xf32> to vector<8x128xf32>
    %21 = arith.addf %18, %20 : vector<8x128xf32>
    %c0_17 = arith.constant 0 : index
    %c0_18 = arith.constant 0 : index
    %22 = vector.load %arg8[%c0_17, %c0_18] : memref<8x128xf32, #tpu.memory_space<vmem>>, vector<8x128xf32>
    tpu.vector_store %arg8[%c0_17, %c0_18], %21 {strides = array<i32>} : memref<8x128xf32, #tpu.memory_space<vmem>>, vector<8x128xf32>,
    return
  }
  func.func @transform_0(%arg0: i32) -> (i32, i32) {
    %c0_i32 = arith.constant 0 : i32
    %c0_i32_0 = arith.constant 0 : i32
    return %arg0, %c0_i32 : i32, i32
  }
  func.func @transform_1(%arg0: i32) -> (i32, i32) {
    %c0_i32 = arith.constant 0 : i32
    %c0_i32_0 = arith.constant 0 : i32
    %c0_i32_1 = arith.constant 0 : i32
    return %c0_i32, %c0_i32_0 : i32, i32
  }
  func.func @transform_2(%arg0: i32) -> (i32, i32) {
    %c0_i32 = arith.constant 0 : i32
    %c0_i32_0 = arith.constant 0 : i32
    %c0_i32_1 = arith.constant 0 : i32
    return %c0_i32, %c0_i32_0 : i32, i32
  }
  func.func @transform_3(%arg0: i32) -> (i32, i32) {
    %c0_i32 = arith.constant 0 : i32
    %c0_i32_0 = arith.constant 0 : i32
    %c0_i32_1 = arith.constant 0 : i32
    return %c0_i32, %c0_i32_0 : i32, i32
  }
  func.func @transform_4(%arg0: i32) -> (i32, i32) {
    %c0_i32 = arith.constant 0 : i32
    %c0_i32_0 = arith.constant 0 : i32
    %c0_i32_1 = arith.constant 0 : i32
    return %c0_i32, %c0_i32_0 : i32, i32
  }
  func.func @transform_5(%arg0: i32) -> (i32, i32) {
    %c0_i32 = arith.constant 0 : i32
    %c0_i32_0 = arith.constant 0 : i32
    %c0_i32_1 = arith.constant 0 : i32
    return %c0_i32, %c0_i32_0 : i32, i32
  }
  func.func @transform_6(%arg0: i32) -> (i32, i32) {
    %c0_i32 = arith.constant 0 : i32
    %c0_i32_0 = arith.constant 0 : i32
    %c0_i32_1 = arith.constant 0 : i32
    return %c0_i32, %c0_i32_0 : i32, i32
  }
  func.func @transform_7(%arg0: i32) -> (i32, i32) {
    %c0_i32 = arith.constant 0 : i32
    %c0_i32_0 = arith.constant 0 : i32
    return %arg0, %c0_i32 : i32, i32
  }
}

</mosaic_0001>

<bundles_post_ra>
// kernel: lenet5_vgg_forward.3
= control target key start
LH: loop header
LB: loop body
LE: loop exit
PB: predicated region body
PF: predicated region fallthrough
CT: control target
= control target key end

     0   :  { %s2916_s4 = inlined_call_operand.vmem [shape: bf16[128,128], index: 4, kind: input, shape index: {}]   ;;  %s2917_s0 = inlined_call_operand.vmem [shape: bf16[392,128], index: 0, kind: input, shape index: {}]   ;;  %s2918_s1 = inlined_call_operand.vmem [shape: bf16[392,128], index: 1, kind: input, shape index: {}]   ;;  %s2919_s2 = inlined_call_operand.vmem [shape: bf16[392,128], index: 2, kind: input, shape index: {}]   ;;  %s2920_s3 = inlined_call_operand.vmem [shape: bf16[392,128], index: 3, kind: input, shape index: {}]   ;;  %s2921_s5 = inlined_call_operand.vmem [shape: f32[1,128], index: 5, kind: input, shape index: {}]   ;;  %s2922_s6 = inlined_call_operand.vmem [shape: bf16[392,128], index: 6, kind: output, shape index: {}]  }
   0x1   :  { %v2181_v0 = vld [vmem:[%s2916_s4 + $0x38] sm:$0xff]  ;;  %v2180_v1 = vld [vmem:[%s2916_s4 + $0x30] sm:$0xff]  ;;  %v2179_v2 = vld [vmem:[%s2916_s4 + $0x28] sm:$0xff] }
   0x2   :  { %284 = vmatpush.bf16.msra.mxu0 %v2181_v0  ;;  %614 = vmatpush.bf16.msra.mxu1 %v2181_v0  ;;  %v2178_v3 = vld [vmem:[%s2916_s4 + $0x20] sm:$0xff]  ;;  %v2177_v4 = vld [vmem:[%s2916_s4 + $0x18] sm:$0xff]  ;;  %v2176_v5 = vld [vmem:[%s2916_s4 + $0x10] sm:$0xff] }
   0x3   :  { %993 = vmatpush.bf16.msra.mxu2 %v2181_v0  ;;  %1372 = vmatpush.bf16.msra.mxu3 %v2181_v0  ;;  %v2175_v6 = vld [vmem:[%s2916_s4 + $0x8] sm:$0xff]  ;;  %v2174_v7 = vld [vmem:[%s2916_s4] sm:$0xff]  ;;  %v2184_v16 = vld [vmem:[%s2917_s0 + $0x10] sm:$0xff] }
   0x4   :  { %v2182_v8 = vld [vmem:[%s2917_s0] sm:$0xff]  ;;  %v2183_v12 = vld [vmem:[%s2917_s0 + $0x8] sm:$0xff]  ;;  %v2208_v17 = vld [vmem:[%s2918_s1 + $0x10] sm:$0xff] }
   0x5   :  { %v2206_v9 = vld [vmem:[%s2918_s1] sm:$0xff]  ;;  %v2207_v13 = vld [vmem:[%s2918_s1 + $0x8] sm:$0xff]  ;;  %v2232_v18 = vld [vmem:[%s2919_s2 + $0x10] sm:$0xff] }
   0x6   :  { %285 = vmatpush.bf16.msra.mxu0 %v2180_v1  ;;  %615 = vmatpush.bf16.msra.mxu1 %v2180_v1  ;;  %v2230_v10 = vld [vmem:[%s2919_s2] sm:$0xff]  ;;  %v2231_v14 = vld [vmem:[%s2919_s2 + $0x8] sm:$0xff]  ;;  %v2256_v19 = vld [vmem:[%s2920_s3 + $0x10] sm:$0xff] }
   0x7   :  { %994 = vmatpush.bf16.msra.mxu2 %v2180_v1  ;;  %1373 = vmatpush.bf16.msra.mxu3 %v2180_v1  ;;  %v2254_v11 = vld [vmem:[%s2920_s3] sm:$0xff]  ;;  %v2255_v15 = vld [vmem:[%s2920_s3 + $0x8] sm:$0xff]  ;;  %v2185_v20 = vld [vmem:[%s2917_s0 + $0x18] sm:$0xff] }
   0x8   :  { %v2209_v21 = vld [vmem:[%s2918_s1 + $0x18] sm:$0xff]  ;;  %v2186_v24 = vld [vmem:[%s2917_s0 + $0x20] sm:$0xff]  ;;  %v2187_v28 = vld [vmem:[%s2917_s0 + $0x28] sm:$0xff] }
   0x9   :  { %v2233_v22 = vld [vmem:[%s2919_s2 + $0x18] sm:$0xff]  ;;  %v2210_v25 = vld [vmem:[%s2918_s1 + $0x20] sm:$0xff]  ;;  %v2211_v29 = vld [vmem:[%s2918_s1 + $0x28] sm:$0xff] }
   0xa   :  { %286 = vmatpush.bf16.msra.mxu0 %v2179_v2  ;;  %616 = vmatpush.bf16.msra.mxu1 %v2179_v2  ;;  %v2257_v23 = vld [vmem:[%s2920_s3 + $0x18] sm:$0xff]  ;;  %v2234_v26 = vld [vmem:[%s2919_s2 + $0x20] sm:$0xff]  ;;  %v2235_v30 = vld [vmem:[%s2919_s2 + $0x28] sm:$0xff] }
   0xb   :  { %995 = vmatpush.bf16.msra.mxu2 %v2179_v2  ;;  %1374 = vmatpush.bf16.msra.mxu3 %v2179_v2  ;;  %v2258_v27 = vld [vmem:[%s2920_s3 + $0x20] sm:$0xff]  ;;  %v2259_v31 = vld [vmem:[%s2920_s3 + $0x28] sm:$0xff]  ;;  %v2188_v32 = vld [vmem:[%s2917_s0 + $0x30] sm:$0xff] }
   0xc   :  { %v2212_v33 = vld [vmem:[%s2918_s1 + $0x30] sm:$0xff]  ;;  %v2189_v36 = vld [vmem:[%s2917_s0 + $0x38] sm:$0xff]  ;;  %v2190_v40 = vld [vmem:[%s2917_s0 + $0x40] sm:$0xff] }
   0xd   :  { %v2236_v34 = vld [vmem:[%s2919_s2 + $0x30] sm:$0xff]  ;;  %v2213_v37 = vld [vmem:[%s2918_s1 + $0x38] sm:$0xff]  ;;  %v2214_v41 = vld [vmem:[%s2918_s1 + $0x40] sm:$0xff] }
   0xe   :  { %287 = vmatpush.bf16.msra.mxu0 %v2178_v3  ;;  %617 = vmatpush.bf16.msra.mxu1 %v2178_v3  ;;  %v2260_v35 = vld [vmem:[%s2920_s3 + $0x30] sm:$0xff]  ;;  %v2237_v38 = vld [vmem:[%s2919_s2 + $0x38] sm:$0xff]  ;;  %v2238_v44 = vld [vmem:[%s2919_s2 + $0x40] sm:$0xff] }
   0xf   :  { %996 = vmatpush.bf16.msra.mxu2 %v2178_v3  ;;  %1375 = vmatpush.bf16.msra.mxu3 %v2178_v3  ;;  %v2261_v39 = vld [vmem:[%s2920_s3 + $0x38] sm:$0xff]  ;;  %v2262_v45 = vld [vmem:[%s2920_s3 + $0x40] sm:$0xff]  ;;  %v2191_v57 = vld [vmem:[%s2917_s0 + $0x48] sm:$0xff] }
  0x10   :  { %v2593_v53 = vld [vmem:[%s2921_s5] ss:$0 sm:$0xff]  ;;  %v2215_v58 = vld [vmem:[%s2918_s1 + $0x48] sm:$0xff] }
  0x11   :  { %v2239_v62 = vld [vmem:[%s2919_s2 + $0x48] sm:$0xff] }
  0x12   :  { %288 = vmatpush.bf16.msra.mxu0 %v2177_v4  ;;  %618 = vmatpush.bf16.msra.mxu1 %v2177_v4  ;;  %v2263_v63 = vld [vmem:[%s2920_s3 + $0x48] sm:$0xff] }
  0x13   :  { %997 = vmatpush.bf16.msra.mxu2 %v2177_v4  ;;  %1376 = vmatpush.bf16.msra.mxu3 %v2177_v4 }
  0x16   :  { %289 = vmatpush.bf16.msra.mxu0 %v2176_v5  ;;  %619 = vmatpush.bf16.msra.mxu1 %v2176_v5 }
  0x17   :  { %998 = vmatpush.bf16.msra.mxu2 %v2176_v5  ;;  %1377 = vmatpush.bf16.msra.mxu3 %v2176_v5 }
  0x1a   :  { %290 = vmatpush.bf16.msra.mxu0 %v2175_v6  ;;  %620 = vmatpush.bf16.msra.mxu1 %v2175_v6 }
  0x1b   :  { %999 = vmatpush.bf16.msra.mxu2 %v2175_v6  ;;  %1378 = vmatpush.bf16.msra.mxu3 %v2175_v6 }
  0x1e   :  { %291 = vmatpush.bf16.msra.mxu0 %v2174_v7  ;;  %621 = vmatpush.bf16.msra.mxu1 %v2174_v7 }
  0x1f   :  { %1000 = vmatpush.bf16.msra.mxu2 %v2174_v7  ;;  %1379 = vmatpush.bf16.msra.mxu3 %v2174_v7 }
  0x21   :  { %292 = vmatmul.bf16.vlgmr.msra.gmra.mxu0 %v2182_v8  ;;  %622 = vmatmul.bf16.vlgmr.msra.gmra.mxu1 %v2206_v9 }
  0x22   :  { %1001 = vmatmul.bf16.vlgmr.msra.gmra.mxu2 %v2230_v10  ;;  %1380 = vmatmul.bf16.vlgmr.msra.gmra.mxu3 %v2254_v11 }
  0x31   :  { %297 = vmatmul.bf16.gmra.mxu0 %v2183_v12  ;;  %627 = vmatmul.bf16.gmra.mxu1 %v2207_v13 }
  0x32   :  { %1006 = vmatmul.bf16.gmra.mxu2 %v2231_v14  ;;  %1385 = vmatmul.bf16.gmra.mxu3 %v2255_v15 }
  0x41   :  { %302 = vmatmul.bf16.gmra.mxu0 %v2184_v16  ;;  %632 = vmatmul.bf16.gmra.mxu1 %v2208_v17  ;;  %v2192_v16 = vld [vmem:[%s2917_s0 + $0x50] sm:$0xff] }
  0x42   :  { %1011 = vmatmul.bf16.gmra.mxu2 %v2232_v18  ;;  %1390 = vmatmul.bf16.gmra.mxu3 %v2256_v19  ;;  %v2216_v17 = vld [vmem:[%s2918_s1 + $0x50] sm:$0xff] }
  0x51   :  { %307 = vmatmul.bf16.gmra.mxu0 %v2185_v20  ;;  %637 = vmatmul.bf16.gmra.mxu1 %v2209_v21  ;;  %v2240_v21 = vld [vmem:[%s2919_s2 + $0x50] sm:$0xff] }
  0x52   :  { %1016 = vmatmul.bf16.gmra.mxu2 %v2233_v22  ;;  %1395 = vmatmul.bf16.gmra.mxu3 %v2257_v23  ;;  %v2264_v22 = vld [vmem:[%s2920_s3 + $0x50] sm:$0xff] }
  0x61   :  { %312 = vmatmul.bf16.gmra.mxu0 %v2186_v24  ;;  %642 = vmatmul.bf16.gmra.mxu1 %v2210_v25 }
  0x62   :  { %1021 = vmatmul.bf16.gmra.mxu2 %v2234_v26  ;;  %1400 = vmatmul.bf16.gmra.mxu3 %v2258_v27 }
  0x71   :  { %317 = vmatmul.bf16.gmra.mxu0 %v2187_v28  ;;  %647 = vmatmul.bf16.gmra.mxu1 %v2211_v29 }
  0x72   :  { %1026 = vmatmul.bf16.gmra.mxu2 %v2235_v30  ;;  %1405 = vmatmul.bf16.gmra.mxu3 %v2259_v31 }
  0x81   :  { %322 = vmatmul.bf16.gmra.mxu0 %v2188_v32  ;;  %652 = vmatmul.bf16.gmra.mxu1 %v2212_v33 }
  0x82   :  { %1031 = vmatmul.bf16.gmra.mxu2 %v2236_v34  ;;  %1410 = vmatmul.bf16.gmra.mxu3 %v2260_v35 }
  0x91   :  { %327 = vmatmul.bf16.gmra.mxu0 %v2189_v36  ;;  %657 = vmatmul.bf16.gmra.mxu1 %v2213_v37 }
  0x92   :  { %1036 = vmatmul.bf16.gmra.mxu2 %v2237_v38  ;;  %1415 = vmatmul.bf16.gmra.mxu3 %v2261_v39  ;;  %v2193_v39 = vld [vmem:[%s2917_s0 + $0x58] sm:$0xff] }
  0x9e   :  { %v293_v42 = vpop.f32.mrf.mxu0  ;;  %v623_v43 = vpop.f32.mrf.mxu1 }
  0x9f   :  { %v747_v46 = vmax.f32 %v293_v42, %v623_v43 }
  0xa1   :  { %332 = vmatmul.bf16.gmra.mxu0 %v2190_v40  ;;  %662 = vmatmul.bf16.gmra.mxu1 %v2214_v41  ;;  %v2217_v40 = vld [vmem:[%s2918_s1 + $0x58] sm:$0xff] }
  0xa2   :  { %1041 = vmatmul.bf16.gmra.mxu2 %v2238_v44  ;;  %1420 = vmatmul.bf16.gmra.mxu3 %v2262_v45  ;;  %v2241_v44 = vld [vmem:[%s2919_s2 + $0x58] sm:$0xff] }
  0xa3   :  { %v2265_v45 = vld [vmem:[%s2920_s3 + $0x58] sm:$0xff] }
  0xa5   :  { %v1002_v47 = vpop.f32.mrf.mxu2  ;;  %v1381_v48 = vpop.f32.mrf.mxu3 }
  0xa6   :  { %v295_v49 = vpop.f32.mrf.mxu0  ;;  %v625_v50 = vpop.f32.mrf.mxu1  ;;  %v1126_v51 = vmax.f32 %v747_v46, %v1002_v47 }
  0xa7   :  { %v748_v54 = vmax.f32 %v295_v49, %v625_v50 }
  0xa8   :  { %v1505_v52 = vmax.f32 %v1126_v51, %v1381_v48 }
  0xaa   :  { %v1558_v0 = vadd.f32 %v2593_v53, %v1505_v52 }
  0xac   :  { %v1607_v3 = vmax.f32 %v1558_v0, 0.0  ;;  %v2218_v0 = vld [vmem:[%s2918_s1 + $0x60] sm:$0xff] }
  0xad   :  { %v1004_v55 = vpop.f32.mrf.mxu2  ;;  %v1383_v56 = vpop.f32.mrf.mxu3 }
  0xae   :  { %v1127_v59 = vmax.f32 %v748_v54, %v1004_v55  ;;  %v298_v60 = vpop.f32.mrf.mxu0  ;;  %v628_v61 = vpop.f32.mrf.mxu1 }
  0xaf   :  { %v749_v5 = vmax.f32 %v298_v60, %v628_v61 }
  0xb0   :  { %v1506_v1 = vmax.f32 %v1127_v59, %v1383_v56 }
  0xb1   :  { %337 = vmatmul.bf16.gmra.mxu0 %v2191_v57  ;;  %667 = vmatmul.bf16.gmra.mxu1 %v2215_v58 }
  0xb2   :  { %v1559_v2 = vadd.f32 %v2593_v53, %v1506_v1  ;;  %1046 = vmatmul.bf16.gmra.mxu2 %v2239_v62  ;;  %1425 = vmatmul.bf16.gmra.mxu3 %v2263_v63  ;;  %v2194_v63 = vld [vmem:[%s2917_s0 + $0x60] sm:$0xff] }
  0xb4   :  { %v1608_v4 = vmax.f32 %v1559_v2, 0.0 }
  0xb5   :  { %v1007_v6 = vpop.f32.mrf.mxu2  ;;  %v1386_v7 = vpop.f32.mrf.mxu3 }
  0xb6   :  { %v2281_v8 = vpack.c.bf16 %v1608_v4, %v1607_v3  ;;  %v300_v9 = vpop.f32.mrf.mxu0  ;;  %v630_v10 = vpop.f32.mrf.mxu1  ;;  %v1128_v11 = vmax.f32 %v749_v5, %v1007_v6  ;;  %v2242_v4 = vld [vmem:[%s2919_s2 + $0x60] sm:$0xff] }
  0xb7   :  { %v750_v13 = vmax.f32 %v300_v9, %v630_v10  ;;  %v2266_v5 = vld [vmem:[%s2920_s3 + $0x60] sm:$0xff] }
  0xb8   :  { %2282 = vst [vmem:[%s2922_s6] sm:$0xff] %v2281_v8   ;;  %v1507_v12 = vmax.f32 %v1128_v11, %v1386_v7 }
  0xba   :  { %v1560_v23 = vadd.f32 %v2593_v53, %v1507_v12 }
  0xbc   :  { %v1609_v26 = vmax.f32 %v1560_v23, 0.0  ;;  %v2219_v23 = vld [vmem:[%s2918_s1 + $0x68] sm:$0xff] }
  0xbd   :  { %v1009_v14 = vpop.f32.mrf.mxu2  ;;  %v1388_v15 = vpop.f32.mrf.mxu3 }
  0xbe   :  { %v1129_v18 = vmax.f32 %v750_v13, %v1009_v14  ;;  %v303_v19 = vpop.f32.mrf.mxu0  ;;  %v633_v20 = vpop.f32.mrf.mxu1 }
  0xbf   :  { %v751_v28 = vmax.f32 %v303_v19, %v633_v20 }
  0xc0   :  { %v1508_v24 = vmax.f32 %v1129_v18, %v1388_v15 }
  0xc1   :  { %342 = vmatmul.bf16.gmra.mxu0 %v2192_v16  ;;  %672 = vmatmul.bf16.gmra.mxu1 %v2216_v17 }
  0xc2   :  { %v1561_v25 = vadd.f32 %v2593_v53, %v1508_v24  ;;  %1051 = vmatmul.bf16.gmra.mxu2 %v2240_v21  ;;  %1430 = vmatmul.bf16.gmra.mxu3 %v2264_v22  ;;  %v2195_v22 = vld [vmem:[%s2917_s0 + $0x68] sm:$0xff] }
  0xc4   :  { %v1610_v27 = vmax.f32 %v1561_v25, 0.0 }
  0xc5   :  { %v1012_v29 = vpop.f32.mrf.mxu2  ;;  %v1391_v30 = vpop.f32.mrf.mxu3 }
  0xc6   :  { %v2286_v31 = vpack.c.bf16 %v1610_v27, %v1609_v26  ;;  %v305_v32 = vpop.f32.mrf.mxu0  ;;  %v635_v33 = vpop.f32.mrf.mxu1  ;;  %v1130_v34 = vmax.f32 %v751_v28, %v1012_v29  ;;  %v2243_v27 = vld [vmem:[%s2919_s2 + $0x68] sm:$0xff] }
  0xc7   :  { %v752_v36 = vmax.f32 %v305_v32, %v635_v33  ;;  %v2267_v28 = vld [vmem:[%s2920_s3 + $0x68] sm:$0xff] }
  0xc8   :  { %2398 = vst [vmem:[%s2922_s6 + $0x8] sm:$0xff] %v2286_v31   ;;  %v1509_v35 = vmax.f32 %v1130_v34, %v1391_v30 }
  0xca   :  { %v1562_v46 = vadd.f32 %v2593_v53, %v1509_v35 }
  0xcc   :  { %v1611_v49 = vmax.f32 %v1562_v46, 0.0  ;;  %v2220_v46 = vld [vmem:[%s2918_s1 + $0x70] sm:$0xff] }
  0xcd   :  { %v1014_v37 = vpop.f32.mrf.mxu2  ;;  %v1393_v38 = vpop.f32.mrf.mxu3 }
  0xce   :  { %v1131_v41 = vmax.f32 %v752_v36, %v1014_v37  ;;  %v308_v42 = vpop.f32.mrf.mxu0  ;;  %v638_v43 = vpop.f32.mrf.mxu1 }
  0xcf   :  { %v753_v51 = vmax.f32 %v308_v42, %v638_v43 }
  0xd0   :  { %v1510_v47 = vmax.f32 %v1131_v41, %v1393_v38 }
  0xd1   :  { %347 = vmatmul.bf16.gmra.mxu0 %v2193_v39  ;;  %677 = vmatmul.bf16.gmra.mxu1 %v2217_v40 }
  0xd2   :  { %v1563_v48 = vadd.f32 %v2593_v53, %v1510_v47  ;;  %1056 = vmatmul.bf16.gmra.mxu2 %v2241_v44  ;;  %1435 = vmatmul.bf16.gmra.mxu3 %v2265_v45  ;;  %v2196_v45 = vld [vmem:[%s2917_s0 + $0x70] sm:$0xff] }
  0xd4   :  { %v1612_v50 = vmax.f32 %v1563_v48, 0.0 }
  0xd5   :  { %v1017_v52 = vpop.f32.mrf.mxu2  ;;  %v1396_v54 = vpop.f32.mrf.mxu3 }
  0xd6   :  { %v2291_v55 = vpack.c.bf16 %v1612_v50, %v1611_v49  ;;  %v310_v56 = vpop.f32.mrf.mxu0  ;;  %v640_v57 = vpop.f32.mrf.mxu1  ;;  %v1132_v58 = vmax.f32 %v753_v51, %v1017_v52  ;;  %v2244_v50 = vld [vmem:[%s2919_s2 + $0x70] sm:$0xff] }
  0xd7   :  { %v754_v60 = vmax.f32 %v310_v56, %v640_v57  ;;  %v2268_v51 = vld [vmem:[%s2920_s3 + $0x70] sm:$0xff] }
  0xd8   :  { %2399 = vst [vmem:[%s2922_s6 + $0x10] sm:$0xff] %v2291_v55   ;;  %v1511_v59 = vmax.f32 %v1132_v58, %v1396_v54 }
  0xda   :  { %v1564_v6 = vadd.f32 %v2593_v53, %v1511_v59 }
  0xdc   :  { %v1613_v9 = vmax.f32 %v1564_v6, 0.0  ;;  %v2221_v6 = vld [vmem:[%s2918_s1 + $0x78] sm:$0xff] }
  0xdd   :  { %v1019_v61 = vpop.f32.mrf.mxu2  ;;  %v1398_v62 = vpop.f32.mrf.mxu3 }
  0xde   :  { %v1133_v1 = vmax.f32 %v754_v60, %v1019_v61  ;;  %v313_v2 = vpop.f32.mrf.mxu0  ;;  %v643_v3 = vpop.f32.mrf.mxu1 }
  0xdf   :  { %v755_v11 = vmax.f32 %v313_v2, %v643_v3 }
  0xe0   :  { %v1512_v7 = vmax.f32 %v1133_v1, %v1398_v62 }
  0xe1   :  { %352 = vmatmul.bf16.gmra.mxu0 %v2194_v63  ;;  %682 = vmatmul.bf16.gmra.mxu1 %v2218_v0 }
  0xe2   :  { %v1565_v8 = vadd.f32 %v2593_v53, %v1512_v7  ;;  %1061 = vmatmul.bf16.gmra.mxu2 %v2242_v4  ;;  %1440 = vmatmul.bf16.gmra.mxu3 %v2266_v5  ;;  %v2197_v5 = vld [vmem:[%s2917_s0 + $0x78] sm:$0xff] }
  0xe4   :  { %v1614_v10 = vmax.f32 %v1565_v8, 0.0 }
  0xe5   :  { %v1022_v12 = vpop.f32.mrf.mxu2  ;;  %v1401_v13 = vpop.f32.mrf.mxu3 }
  0xe6   :  { %v2296_v14 = vpack.c.bf16 %v1614_v10, %v1613_v9  ;;  %v315_v15 = vpop.f32.mrf.mxu0  ;;  %v645_v16 = vpop.f32.mrf.mxu1  ;;  %v1134_v17 = vmax.f32 %v755_v11, %v1022_v12  ;;  %v2245_v10 = vld [vmem:[%s2919_s2 + $0x78] sm:$0xff] }
  0xe7   :  { %v756_v19 = vmax.f32 %v315_v15, %v645_v16  ;;  %v2269_v11 = vld [vmem:[%s2920_s3 + $0x78] sm:$0xff] }
  0xe8   :  { %2400 = vst [vmem:[%s2922_s6 + $0x18] sm:$0xff] %v2296_v14   ;;  %v1513_v18 = vmax.f32 %v1134_v17, %v1401_v13 }
  0xea   :  { %v1566_v29 = vadd.f32 %v2593_v53, %v1513_v18 }
  0xec   :  { %v1615_v32 = vmax.f32 %v1566_v29, 0.0  ;;  %v2222_v29 = vld [vmem:[%s2918_s1 + $0x80] sm:$0xff] }
  0xed   :  { %v1024_v20 = vpop.f32.mrf.mxu2  ;;  %v1403_v21 = vpop.f32.mrf.mxu3 }
  0xee   :  { %v1135_v24 = vmax.f32 %v756_v19, %v1024_v20  ;;  %v318_v25 = vpop.f32.mrf.mxu0  ;;  %v648_v26 = vpop.f32.mrf.mxu1 }
  0xef   :  { %v757_v34 = vmax.f32 %v318_v25, %v648_v26 }
  0xf0   :  { %v1514_v30 = vmax.f32 %v1135_v24, %v1403_v21 }
  0xf1   :  { %357 = vmatmul.bf16.gmra.mxu0 %v2195_v22  ;;  %687 = vmatmul.bf16.gmra.mxu1 %v2219_v23 }
  0xf2   :  { %v1567_v31 = vadd.f32 %v2593_v53, %v1514_v30  ;;  %1066 = vmatmul.bf16.gmra.mxu2 %v2243_v27  ;;  %1445 = vmatmul.bf16.gmra.mxu3 %v2267_v28  ;;  %v2198_v28 = vld [vmem:[%s2917_s0 + $0x80] sm:$0xff] }
  0xf4   :  { %v1616_v33 = vmax.f32 %v1567_v31, 0.0 }
  0xf5   :  { %v1027_v35 = vpop.f32.mrf.mxu2  ;;  %v1406_v36 = vpop.f32.mrf.mxu3 }
  0xf6   :  { %v2301_v37 = vpack.c.bf16 %v1616_v33, %v1615_v32  ;;  %v320_v38 = vpop.f32.mrf.mxu0  ;;  %v650_v39 = vpop.f32.mrf.mxu1  ;;  %v1136_v40 = vmax.f32 %v757_v34, %v1027_v35  ;;  %v2246_v33 = vld [vmem:[%s2919_s2 + $0x80] sm:$0xff] }
  0xf7   :  { %v758_v42 = vmax.f32 %v320_v38, %v650_v39  ;;  %v2270_v34 = vld [vmem:[%s2920_s3 + $0x80] sm:$0xff] }
  0xf8   :  { %2401 = vst [vmem:[%s2922_s6 + $0x20] sm:$0xff] %v2301_v37   ;;  %v1515_v41 = vmax.f32 %v1136_v40, %v1406_v36 }
  0xfa   :  { %v1568_v52 = vadd.f32 %v2593_v53, %v1515_v41 }
  0xfc   :  { %v1617_v56 = vmax.f32 %v1568_v52, 0.0  ;;  %v2223_v52 = vld [vmem:[%s2918_s1 + $0x88] sm:$0xff] }
  0xfd   :  { %v1029_v43 = vpop.f32.mrf.mxu2  ;;  %v1408_v44 = vpop.f32.mrf.mxu3 }
  0xfe   :  { %v1137_v47 = vmax.f32 %v758_v42, %v1029_v43  ;;  %v323_v48 = vpop.f32.mrf.mxu0  ;;  %v653_v49 = vpop.f32.mrf.mxu1 }
  0xff   :  { %v759_v58 = vmax.f32 %v323_v48, %v653_v49 }
 0x100   :  { %v1516_v54 = vmax.f32 %v1137_v47, %v1408_v44 }
 0x101   :  { %362 = vmatmul.bf16.gmra.mxu0 %v2196_v45  ;;  %692 = vmatmul.bf16.gmra.mxu1 %v2220_v46 }
 0x102   :  { %v1569_v55 = vadd.f32 %v2593_v53, %v1516_v54  ;;  %1071 = vmatmul.bf16.gmra.mxu2 %v2244_v50  ;;  %1450 = vmatmul.bf16.gmra.mxu3 %v2268_v51  ;;  %v2199_v51 = vld [vmem:[%s2917_s0 + $0x88] sm:$0xff] }
 0x104   :  { %v1618_v57 = vmax.f32 %v1569_v55, 0.0 }
 0x105   :  { %v1032_v59 = vpop.f32.mrf.mxu2  ;;  %v1411_v60 = vpop.f32.mrf.mxu3 }
 0x106   :  { %v2306_v61 = vpack.c.bf16 %v1618_v57, %v1617_v56  ;;  %v325_v62 = vpop.f32.mrf.mxu0  ;;  %v655_v63 = vpop.f32.mrf.mxu1  ;;  %v1138_v0 = vmax.f32 %v759_v58, %v1032_v59  ;;  %v2247_v57 = vld [vmem:[%s2919_s2 + $0x88] sm:$0xff] }
 0x107   :  { %v760_v2 = vmax.f32 %v325_v62, %v655_v63  ;;  %v2271_v58 = vld [vmem:[%s2920_s3 + $0x88] sm:$0xff] }
 0x108   :  { %2402 = vst [vmem:[%s2922_s6 + $0x28] sm:$0xff] %v2306_v61   ;;  %v1517_v1 = vmax.f32 %v1138_v0, %v1411_v60 }
 0x10a   :  { %v1570_v12 = vadd.f32 %v2593_v53, %v1517_v1 }
 0x10c   :  { %v1619_v15 = vmax.f32 %v1570_v12, 0.0  ;;  %v2224_v12 = vld [vmem:[%s2918_s1 + $0x90] sm:$0xff] }
 0x10d   :  { %v1034_v3 = vpop.f32.mrf.mxu2  ;;  %v1413_v4 = vpop.f32.mrf.mxu3 }
 0x10e   :  { %v1139_v7 = vmax.f32 %v760_v2, %v1034_v3  ;;  %v328_v8 = vpop.f32.mrf.mxu0  ;;  %v658_v9 = vpop.f32.mrf.mxu1 }
 0x10f   :  { %v761_v17 = vmax.f32 %v328_v8, %v658_v9 }
 0x110   :  { %v1518_v13 = vmax.f32 %v1139_v7, %v1413_v4 }
 0x111   :  { %367 = vmatmul.bf16.gmra.mxu0 %v2197_v5  ;;  %697 = vmatmul.bf16.gmra.mxu1 %v2221_v6 }
 0x112   :  { %v1571_v14 = vadd.f32 %v2593_v53, %v1518_v13  ;;  %1076 = vmatmul.bf16.gmra.mxu2 %v2245_v10  ;;  %1455 = vmatmul.bf16.gmra.mxu3 %v2269_v11  ;;  %v2200_v11 = vld [vmem:[%s2917_s0 + $0x90] sm:$0xff] }
 0x114   :  { %v1620_v16 = vmax.f32 %v1571_v14, 0.0 }
 0x115   :  { %v1037_v18 = vpop.f32.mrf.mxu2  ;;  %v1416_v19 = vpop.f32.mrf.mxu3 }
 0x116   :  { %v2311_v20 = vpack.c.bf16 %v1620_v16, %v1619_v15  ;;  %v330_v21 = vpop.f32.mrf.mxu0  ;;  %v660_v22 = vpop.f32.mrf.mxu1  ;;  %v1140_v23 = vmax.f32 %v761_v17, %v1037_v18  ;;  %v2248_v16 = vld [vmem:[%s2919_s2 + $0x90] sm:$0xff] }
 0x117   :  { %v762_v25 = vmax.f32 %v330_v21, %v660_v22  ;;  %v2272_v17 = vld [vmem:[%s2920_s3 + $0x90] sm:$0xff] }
 0x118   :  { %2403 = vst [vmem:[%s2922_s6 + $0x30] sm:$0xff] %v2311_v20   ;;  %v1519_v24 = vmax.f32 %v1140_v23, %v1416_v19 }
 0x11a   :  { %v1572_v35 = vadd.f32 %v2593_v53, %v1519_v24 }
 0x11c   :  { %v1621_v38 = vmax.f32 %v1572_v35, 0.0  ;;  %v2225_v35 = vld [vmem:[%s2918_s1 + $0x98] sm:$0xff] }
 0x11d   :  { %v1039_v26 = vpop.f32.mrf.mxu2  ;;  %v1418_v27 = vpop.f32.mrf.mxu3 }
 0x11e   :  { %v1141_v30 = vmax.f32 %v762_v25, %v1039_v26  ;;  %v333_v31 = vpop.f32.mrf.mxu0  ;;  %v663_v32 = vpop.f32.mrf.mxu1 }
 0x11f   :  { %v763_v40 = vmax.f32 %v333_v31, %v663_v32 }
 0x120   :  { %v1520_v36 = vmax.f32 %v1141_v30, %v1418_v27 }
 0x121   :  { %372 = vmatmul.bf16.gmra.mxu0 %v2198_v28  ;;  %702 = vmatmul.bf16.gmra.mxu1 %v2222_v29 }
 0x122   :  { %v1573_v37 = vadd.f32 %v2593_v53, %v1520_v36  ;;  %1081 = vmatmul.bf16.gmra.mxu2 %v2246_v33  ;;  %1460 = vmatmul.bf16.gmra.mxu3 %v2270_v34  ;;  %v2201_v34 = vld [vmem:[%s2917_s0 + $0x98] sm:$0xff] }
 0x124   :  { %v1622_v39 = vmax.f32 %v1573_v37, 0.0 }
 0x125   :  { %v1042_v41 = vpop.f32.mrf.mxu2  ;;  %v1421_v42 = vpop.f32.mrf.mxu3 }
 0x126   :  { %v2316_v43 = vpack.c.bf16 %v1622_v39, %v1621_v38  ;;  %v335_v44 = vpop.f32.mrf.mxu0  ;;  %v665_v45 = vpop.f32.mrf.mxu1  ;;  %v1142_v46 = vmax.f32 %v763_v40, %v1042_v41  ;;  %v2249_v39 = vld [vmem:[%s2919_s2 + $0x98] sm:$0xff] }
 0x127   :  { %v764_v48 = vmax.f32 %v335_v44, %v665_v45  ;;  %v2273_v40 = vld [vmem:[%s2920_s3 + $0x98] sm:$0xff] }
 0x128   :  { %2404 = vst [vmem:[%s2922_s6 + $0x38] sm:$0xff] %v2316_v43   ;;  %v1521_v47 = vmax.f32 %v1142_v46, %v1421_v42 }
 0x12a   :  { %v1574_v59 = vadd.f32 %v2593_v53, %v1521_v47 }
 0x12c   :  { %v1623_v62 = vmax.f32 %v1574_v59, 0.0  ;;  %v2226_v59 = vld [vmem:[%s2918_s1 + $0xa0] sm:$0xff] }
 0x12d   :  { %v1044_v49 = vpop.f32.mrf.mxu2  ;;  %v1423_v50 = vpop.f32.mrf.mxu3 }
 0x12e   :  { %v1143_v54 = vmax.f32 %v764_v48, %v1044_v49  ;;  %v338_v55 = vpop.f32.mrf.mxu0  ;;  %v668_v56 = vpop.f32.mrf.mxu1 }
 0x12f   :  { %v765_v0 = vmax.f32 %v338_v55, %v668_v56 }
 0x130   :  { %v1522_v60 = vmax.f32 %v1143_v54, %v1423_v50 }
 0x131   :  { %377 = vmatmul.bf16.gmra.mxu0 %v2199_v51  ;;  %707 = vmatmul.bf16.gmra.mxu1 %v2223_v52 }
 0x132   :  { %v1575_v61 = vadd.f32 %v2593_v53, %v1522_v60  ;;  %1086 = vmatmul.bf16.gmra.mxu2 %v2247_v57  ;;  %1465 = vmatmul.bf16.gmra.mxu3 %v2271_v58  ;;  %v2202_v58 = vld [vmem:[%s2917_s0 + $0xa0] sm:$0xff] }
 0x134   :  { %v1624_v63 = vmax.f32 %v1575_v61, 0.0 }
 0x135   :  { %v1047_v1 = vpop.f32.mrf.mxu2  ;;  %v1426_v2 = vpop.f32.mrf.mxu3 }
 0x136   :  { %v2321_v3 = vpack.c.bf16 %v1624_v63, %v1623_v62  ;;  %v340_v4 = vpop.f32.mrf.mxu0  ;;  %v670_v5 = vpop.f32.mrf.mxu1  ;;  %v1144_v6 = vmax.f32 %v765_v0, %v1047_v1  ;;  %v2250_v63 = vld [vmem:[%s2919_s2 + $0xa0] sm:$0xff] }
 0x137   :  { %v766_v8 = vmax.f32 %v340_v4, %v670_v5  ;;  %v2274_v0 = vld [vmem:[%s2920_s3 + $0xa0] sm:$0xff] }
 0x138   :  { %2405 = vst [vmem:[%s2922_s6 + $0x40] sm:$0xff] %v2321_v3   ;;  %v1523_v7 = vmax.f32 %v1144_v6, %v1426_v2 }
 0x13a   :  { %v1576_v18 = vadd.f32 %v2593_v53, %v1523_v7 }
 0x13c   :  { %v1625_v21 = vmax.f32 %v1576_v18, 0.0  ;;  %v2227_v18 = vld [vmem:[%s2918_s1 + $0xa8] sm:$0xff] }
 0x13d   :  { %v1049_v9 = vpop.f32.mrf.mxu2  ;;  %v1428_v10 = vpop.f32.mrf.mxu3 }
 0x13e   :  { %v1145_v13 = vmax.f32 %v766_v8, %v1049_v9  ;;  %v343_v14 = vpop.f32.mrf.mxu0  ;;  %v673_v15 = vpop.f32.mrf.mxu1 }
 0x13f   :  { %v767_v23 = vmax.f32 %v343_v14, %v673_v15 }
 0x140   :  { %v1524_v19 = vmax.f32 %v1145_v13, %v1428_v10 }
 0x141   :  { %382 = vmatmul.bf16.gmra.mxu0 %v2200_v11  ;;  %712 = vmatmul.bf16.gmra.mxu1 %v2224_v12 }
 0x142   :  { %v1577_v20 = vadd.f32 %v2593_v53, %v1524_v19  ;;  %1091 = vmatmul.bf16.gmra.mxu2 %v2248_v16  ;;  %1470 = vmatmul.bf16.gmra.mxu3 %v2272_v17  ;;  %v2203_v17 = vld [vmem:[%s2917_s0 + $0xa8] sm:$0xff] }
 0x144   :  { %v1626_v22 = vmax.f32 %v1577_v20, 0.0 }
 0x145   :  { %v1052_v24 = vpop.f32.mrf.mxu2  ;;  %v1431_v25 = vpop.f32.mrf.mxu3 }
 0x146   :  { %v2326_v26 = vpack.c.bf16 %v1626_v22, %v1625_v21  ;;  %v345_v27 = vpop.f32.mrf.mxu0  ;;  %v675_v28 = vpop.f32.mrf.mxu1  ;;  %v1146_v29 = vmax.f32 %v767_v23, %v1052_v24  ;;  %v2251_v22 = vld [vmem:[%s2919_s2 + $0xa8] sm:$0xff] }
 0x147   :  { %v768_v31 = vmax.f32 %v345_v27, %v675_v28  ;;  %v2275_v23 = vld [vmem:[%s2920_s3 + $0xa8] sm:$0xff] }
 0x148   :  { %2406 = vst [vmem:[%s2922_s6 + $0x48] sm:$0xff] %v2326_v26   ;;  %v1525_v30 = vmax.f32 %v1146_v29, %v1431_v25 }
 0x14a   :  { %v1578_v41 = vadd.f32 %v2593_v53, %v1525_v30 }
 0x14c   :  { %v1627_v44 = vmax.f32 %v1578_v41, 0.0  ;;  %v2228_v41 = vld [vmem:[%s2918_s1 + $0xb0] sm:$0xff] }
 0x14d   :  { %v1054_v32 = vpop.f32.mrf.mxu2  ;;  %v1433_v33 = vpop.f32.mrf.mxu3 }
 0x14e   :  { %v1147_v36 = vmax.f32 %v768_v31, %v1054_v32  ;;  %v348_v37 = vpop.f32.mrf.mxu0  ;;  %v678_v38 = vpop.f32.mrf.mxu1 }
 0x14f   :  { %v769_v46 = vmax.f32 %v348_v37, %v678_v38 }
 0x150   :  { %v1526_v42 = vmax.f32 %v1147_v36, %v1433_v33 }
 0x151   :  { %387 = vmatmul.bf16.gmra.mxu0 %v2201_v34  ;;  %717 = vmatmul.bf16.gmra.mxu1 %v2225_v35 }
 0x152   :  { %v1579_v43 = vadd.f32 %v2593_v53, %v1526_v42  ;;  %1096 = vmatmul.bf16.gmra.mxu2 %v2249_v39  ;;  %1475 = vmatmul.bf16.gmra.mxu3 %v2273_v40  ;;  %v2204_v40 = vld [vmem:[%s2917_s0 + $0xb0] sm:$0xff] }
 0x154   :  { %v1628_v45 = vmax.f32 %v1579_v43, 0.0 }
 0x155   :  { %v1057_v47 = vpop.f32.mrf.mxu2  ;;  %v1436_v48 = vpop.f32.mrf.mxu3 }
 0x156   :  { %v2331_v49 = vpack.c.bf16 %v1628_v45, %v1627_v44  ;;  %v350_v50 = vpop.f32.mrf.mxu0  ;;  %v680_v51 = vpop.f32.mrf.mxu1  ;;  %v1148_v52 = vmax.f32 %v769_v46, %v1057_v47  ;;  %v2252_v45 = vld [vmem:[%s2919_s2 + $0xb0] sm:$0xff] }
 0x157   :  { %v770_v55 = vmax.f32 %v350_v50, %v680_v51  ;;  %v2276_v46 = vld [vmem:[%s2920_s3 + $0xb0] sm:$0xff] }
 0x158   :  { %2407 = vst [vmem:[%s2922_s6 + $0x50] sm:$0xff] %v2331_v49   ;;  %v1527_v54 = vmax.f32 %v1148_v52, %v1436_v48 }
 0x15a   :  { %v1580_v1 = vadd.f32 %v2593_v53, %v1527_v54 }
 0x15c   :  { %v1629_v4 = vmax.f32 %v1580_v1, 0.0  ;;  %v2229_v1 = vld [vmem:[%s2918_s1 + $0xb8] sm:$0xff] }
 0x15d   :  { %v1059_v56 = vpop.f32.mrf.mxu2  ;;  %v1438_v57 = vpop.f32.mrf.mxu3 }
 0x15e   :  { %v1149_v60 = vmax.f32 %v770_v55, %v1059_v56  ;;  %v353_v61 = vpop.f32.mrf.mxu0  ;;  %v683_v62 = vpop.f32.mrf.mxu1 }
 0x15f   :  { %v771_v6 = vmax.f32 %v353_v61, %v683_v62 }
 0x160   :  { %v1528_v2 = vmax.f32 %v1149_v60, %v1438_v57 }
 0x161   :  { %392 = vmatmul.bf16.gmra.mxu0 %v2202_v58  ;;  %722 = vmatmul.bf16.gmra.mxu1 %v2226_v59 }
 0x162   :  { %v1581_v3 = vadd.f32 %v2593_v53, %v1528_v2  ;;  %1101 = vmatmul.bf16.gmra.mxu2 %v2250_v63  ;;  %1480 = vmatmul.bf16.gmra.mxu3 %v2274_v0  ;;  %v2205_v0 = vld [vmem:[%s2917_s0 + $0xb8] sm:$0xff] }
 0x164   :  { %v1630_v5 = vmax.f32 %v1581_v3, 0.0 }
 0x165   :  { %v1062_v7 = vpop.f32.mrf.mxu2  ;;  %v1441_v8 = vpop.f32.mrf.mxu3 }
 0x166   :  { %v2336_v9 = vpack.c.bf16 %v1630_v5, %v1629_v4  ;;  %v355_v10 = vpop.f32.mrf.mxu0  ;;  %v685_v11 = vpop.f32.mrf.mxu1  ;;  %v1150_v12 = vmax.f32 %v771_v6, %v1062_v7  ;;  %v2253_v5 = vld [vmem:[%s2919_s2 + $0xb8] sm:$0xff] }
 0x167   :  { %v772_v14 = vmax.f32 %v355_v10, %v685_v11  ;;  %v2277_v6 = vld [vmem:[%s2920_s3 + $0xb8] sm:$0xff] }
 0x168   :  { %2408 = vst [vmem:[%s2922_s6 + $0x58] sm:$0xff] %v2336_v9   ;;  %v1529_v13 = vmax.f32 %v1150_v12, %v1441_v8 }
 0x16a   :  { %v1582_v24 = vadd.f32 %v2593_v53, %v1529_v13 }
 0x16c   :  { %v1631_v27 = vmax.f32 %v1582_v24, 0.0 }
 0x16d   :  { %v1064_v15 = vpop.f32.mrf.mxu2  ;;  %v1443_v16 = vpop.f32.mrf.mxu3 }
 0x16e   :  { %v1151_v19 = vmax.f32 %v772_v14, %v1064_v15  ;;  %v358_v20 = vpop.f32.mrf.mxu0  ;;  %v688_v21 = vpop.f32.mrf.mxu1 }
 0x16f   :  { %v773_v29 = vmax.f32 %v358_v20, %v688_v21  ;;  %v844_v20 = vld [vmem:[%s2919_s2 + $0xc0] sm:$0xf] }
 0x170   :  { %v1530_v25 = vmax.f32 %v1151_v19, %v1443_v16  ;;  %v465_v19 = vld [vmem:[%s2918_s1 + $0xc0] sm:$0xf] }
 0x171   :  { %397 = vmatmul.bf16.gmra.mxu0 %v2203_v17  ;;  %727 = vmatmul.bf16.gmra.mxu1 %v2227_v18  ;;  %v87_v18 = vld [vmem:[%s2917_s0 + $0xc0] sm:$0xf]  ;;  %v563_v24 = vunpack.c.l.b16 %v465_v19 }
 0x172   :  { %v1583_v26 = vadd.f32 %v2593_v53, %v1530_v25  ;;  %1106 = vmatmul.bf16.gmra.mxu2 %v2251_v22  ;;  %1485 = vmatmul.bf16.gmra.mxu3 %v2275_v23  ;;  %v1223_v21 = vld [vmem:[%s2920_s3 + $0xc0] sm:$0xf]  ;;  %v185_v23 = vunpack.c.l.b16 %v87_v18  ;;  %v942_v25 = vunpack.c.l.b16 %v844_v20 }
 0x174   :  { %v1632_v28 = vmax.f32 %v1583_v26, 0.0  ;;  %v1321_v26 = vunpack.c.l.b16 %v1223_v21 }
 0x175   :  { %v1067_v30 = vpop.f32.mrf.mxu2  ;;  %v1446_v31 = vpop.f32.mrf.mxu3 }
 0x176   :  { %v2341_v32 = vpack.c.bf16 %v1632_v28, %v1631_v27  ;;  %v360_v33 = vpop.f32.mrf.mxu0  ;;  %v690_v34 = vpop.f32.mrf.mxu1  ;;  %v1152_v35 = vmax.f32 %v773_v29, %v1067_v30 }
 0x177   :  { %v774_v37 = vmax.f32 %v360_v33, %v690_v34 }
 0x178   :  { %2409 = vst [vmem:[%s2922_s6 + $0x60] sm:$0xff] %v2341_v32   ;;  %v1531_v36 = vmax.f32 %v1152_v35, %v1446_v31  ;;  %v210_v31 = vpack.c.b16 %v185_v23, %v185_v23  ;;  %v588_v32 = vpack.c.b16 %v563_v24, %v563_v24 }
 0x17a   :  { %v1584_v47 = vadd.f32 %v2593_v53, %v1531_v36  ;;  %v967_v36 = vpack.c.b16 %v942_v25, %v942_v25 }
 0x17c   :  { %v1633_v50 = vmax.f32 %v1584_v47, 0.0 }
 0x17d   :  { %v1069_v38 = vpop.f32.mrf.mxu2  ;;  %v1448_v39 = vpop.f32.mrf.mxu3 }
 0x17e   :  { %v1153_v42 = vmax.f32 %v774_v37, %v1069_v38  ;;  %v363_v43 = vpop.f32.mrf.mxu0  ;;  %v693_v44 = vpop.f32.mrf.mxu1  ;;  %v1346_v37 = vpack.c.b16 %v1321_v26, %v1321_v26 }
 0x17f   :  { %v775_v52 = vmax.f32 %v363_v43, %v693_v44 }
 0x180   :  { %v1532_v48 = vmax.f32 %v1153_v42, %v1448_v39 }
 0x181   :  { %402 = vmatmul.bf16.gmra.mxu0 %v2204_v40  ;;  %732 = vmatmul.bf16.gmra.mxu1 %v2228_v41 }
 0x182   :  { %v1585_v49 = vadd.f32 %v2593_v53, %v1532_v48  ;;  %1111 = vmatmul.bf16.gmra.mxu2 %v2252_v45  ;;  %1490 = vmatmul.bf16.gmra.mxu3 %v2276_v46 }
 0x184   :  { %v1634_v51 = vmax.f32 %v1585_v49, 0.0 }
 0x185   :  { %v1072_v54 = vpop.f32.mrf.mxu2  ;;  %v1451_v55 = vpop.f32.mrf.mxu3 }
 0x186   :  { %v2346_v56 = vpack.c.bf16 %v1634_v51, %v1633_v50  ;;  %v365_v57 = vpop.f32.mrf.mxu0  ;;  %v695_v58 = vpop.f32.mrf.mxu1  ;;  %v1154_v59 = vmax.f32 %v775_v52, %v1072_v54 }
 0x187   :  { %v776_v61 = vmax.f32 %v365_v57, %v695_v58 }
 0x188   :  { %2410 = vst [vmem:[%s2922_s6 + $0x68] sm:$0xff] %v2346_v56   ;;  %v1533_v60 = vmax.f32 %v1154_v59, %v1451_v55 }
 0x18a   :  { %v1586_v7 = vadd.f32 %v2593_v53, %v1533_v60 }
 0x18c   :  { %v1635_v10 = vmax.f32 %v1586_v7, 0.0 }
 0x18d   :  { %v1074_v62 = vpop.f32.mrf.mxu2  ;;  %v1453_v63 = vpop.f32.mrf.mxu3 }
 0x18e   :  { %v1155_v2 = vmax.f32 %v776_v61, %v1074_v62  ;;  %v368_v3 = vpop.f32.mrf.mxu0  ;;  %v698_v4 = vpop.f32.mrf.mxu1 }
 0x18f   :  { %v777_v12 = vmax.f32 %v368_v3, %v698_v4 }
 0x190   :  { %v1534_v8 = vmax.f32 %v1155_v2, %v1453_v63 }
 0x191   :  { %407 = vmatmul.bf16.gmra.mxu0 %v2205_v0  ;;  %737 = vmatmul.bf16.gmra.mxu1 %v2229_v1 }
 0x192   :  { %v1587_v9 = vadd.f32 %v2593_v53, %v1534_v8  ;;  %1116 = vmatmul.bf16.gmra.mxu2 %v2253_v5  ;;  %1495 = vmatmul.bf16.gmra.mxu3 %v2277_v6 }
 0x194   :  { %v1636_v11 = vmax.f32 %v1587_v9, 0.0 }
 0x195   :  { %v1077_v13 = vpop.f32.mrf.mxu2  ;;  %v1456_v14 = vpop.f32.mrf.mxu3 }
 0x196   :  { %v2351_v15 = vpack.c.bf16 %v1636_v11, %v1635_v10  ;;  %v370_v16 = vpop.f32.mrf.mxu0  ;;  %v700_v17 = vpop.f32.mrf.mxu1  ;;  %v1156_v22 = vmax.f32 %v777_v12, %v1077_v13 }
 0x197   :  { %v778_v28 = vmax.f32 %v370_v16, %v700_v17 }
 0x198   :  { %2411 = vst [vmem:[%s2922_s6 + $0x70] sm:$0xff] %v2351_v15   ;;  %v1535_v27 = vmax.f32 %v1156_v22, %v1456_v14 }
 0x19a   :  { %v1588_v38 = vadd.f32 %v2593_v53, %v1535_v27 }
 0x19c   :  { %v1637_v41 = vmax.f32 %v1588_v38, 0.0 }
 0x19d   :  { %v1079_v29 = vpop.f32.mrf.mxu2  ;;  %v1458_v30 = vpop.f32.mrf.mxu3 }
 0x19e   :  { %v1157_v33 = vmax.f32 %v778_v28, %v1079_v29  ;;  %v373_v34 = vpop.f32.mrf.mxu0  ;;  %v703_v35 = vpop.f32.mrf.mxu1 }
 0x19f   :  { %v779_v43 = vmax.f32 %v373_v34, %v703_v35 }
 0x1a0   :  { %v1536_v39 = vmax.f32 %v1157_v33, %v1458_v30 }
 0x1a1   :  { %412 = vmatmul.bf16.gmra.mxu0 %v210_v31  ;;  %742 = vmatmul.bf16.gmra.mxu1 %v588_v32 }
 0x1a2   :  { %v1589_v40 = vadd.f32 %v2593_v53, %v1536_v39  ;;  %1121 = vmatmul.bf16.gmra.mxu2 %v967_v36  ;;  %1500 = vmatmul.bf16.gmra.mxu3 %v1346_v37 }
 0x1a4   :  { %v1638_v42 = vmax.f32 %v1589_v40, 0.0 }
 0x1a5   :  { %v1082_v44 = vpop.f32.mrf.mxu2  ;;  %v1461_v45 = vpop.f32.mrf.mxu3 }
 0x1a6   :  { %v2356_v46 = vpack.c.bf16 %v1638_v42, %v1637_v41  ;;  %v375_v47 = vpop.f32.mrf.mxu0  ;;  %v705_v48 = vpop.f32.mrf.mxu1  ;;  %v1158_v49 = vmax.f32 %v779_v43, %v1082_v44 }
 0x1a7   :  { %v780_v51 = vmax.f32 %v375_v47, %v705_v48 }
 0x1a8   :  { %2412 = vst [vmem:[%s2922_s6 + $0x78] sm:$0xff] %v2356_v46   ;;  %v1537_v50 = vmax.f32 %v1158_v49, %v1461_v45 }
 0x1aa   :  { %v1590_v58 = vadd.f32 %v2593_v53, %v1537_v50  ;;  %v2885_v50 = vld [vmem:[%s2921_s5] ss:$0 sm:$0xff] }
 0x1ac   :  { %v1639_v61 = vmax.f32 %v1590_v58, 0.0 }
 0x1ad   :  { %v1084_v52 = vpop.f32.mrf.mxu2  ;;  %v1463_v54 = vpop.f32.mrf.mxu3 }
 0x1ae   :  { %v1159_v55 = vmax.f32 %v780_v51, %v1084_v52  ;;  %v378_v56 = vpop.f32.mrf.mxu0  ;;  %v708_v57 = vpop.f32.mrf.mxu1 }
 0x1af   :  { %v781_v63 = vmax.f32 %v378_v56, %v708_v57 }
 0x1b0   :  { %v1538_v59 = vmax.f32 %v1159_v55, %v1463_v54 }
 0x1b2   :  { %v1591_v60 = vadd.f32 %v2593_v53, %v1538_v59 }
 0x1b4   :  { %v1640_v62 = vmax.f32 %v1591_v60, 0.0 }
 0x1b5   :  { %v1087_v0 = vpop.f32.mrf.mxu2  ;;  %v1466_v1 = vpop.f32.mrf.mxu3 }
 0x1b6   :  { %v2361_v2 = vpack.c.bf16 %v1640_v62, %v1639_v61  ;;  %v380_v3 = vpop.f32.mrf.mxu0  ;;  %v710_v4 = vpop.f32.mrf.mxu1  ;;  %v1160_v5 = vmax.f32 %v781_v63, %v1087_v0 }
 0x1b7   :  { %v782_v7 = vmax.f32 %v380_v3, %v710_v4 }
 0x1b8   :  { %2413 = vst [vmem:[%s2922_s6 + $0x80] sm:$0xff] %v2361_v2   ;;  %v1539_v6 = vmax.f32 %v1160_v5, %v1466_v1 }
 0x1ba   :  { %v1592_v13 = vadd.f32 %v2593_v53, %v1539_v6 }
 0x1bc   :  { %v1641_v16 = vmax.f32 %v1592_v13, 0.0 }
 0x1bd   :  { %v1089_v8 = vpop.f32.mrf.mxu2  ;;  %v1468_v9 = vpop.f32.mrf.mxu3 }
 0x1be   :  { %v1161_v10 = vmax.f32 %v782_v7, %v1089_v8  ;;  %v383_v11 = vpop.f32.mrf.mxu0  ;;  %v713_v12 = vpop.f32.mrf.mxu1 }
 0x1bf   :  { %v783_v18 = vmax.f32 %v383_v11, %v713_v12 }
 0x1c0   :  { %v1540_v14 = vmax.f32 %v1161_v10, %v1468_v9 }
 0x1c2   :  { %v1593_v15 = vadd.f32 %v2593_v53, %v1540_v14 }
 0x1c4   :  { %v1642_v17 = vmax.f32 %v1593_v15, 0.0 }
 0x1c5   :  { %v1092_v19 = vpop.f32.mrf.mxu2  ;;  %v1471_v20 = vpop.f32.mrf.mxu3 }
 0x1c6   :  { %v2366_v21 = vpack.c.bf16 %v1642_v17, %v1641_v16  ;;  %v385_v22 = vpop.f32.mrf.mxu0  ;;  %v715_v23 = vpop.f32.mrf.mxu1  ;;  %v1162_v24 = vmax.f32 %v783_v18, %v1092_v19 }
 0x1c7   :  { %v784_v26 = vmax.f32 %v385_v22, %v715_v23 }
 0x1c8   :  { %2414 = vst [vmem:[%s2922_s6 + $0x88] sm:$0xff] %v2366_v21   ;;  %v1541_v25 = vmax.f32 %v1162_v24, %v1471_v20 }
 0x1ca   :  { %v1594_v32 = vadd.f32 %v2593_v53, %v1541_v25 }
 0x1cc   :  { %v1643_v35 = vmax.f32 %v1594_v32, 0.0 }
 0x1cd   :  { %v1094_v27 = vpop.f32.mrf.mxu2  ;;  %v1473_v28 = vpop.f32.mrf.mxu3 }
 0x1ce   :  { %v1163_v29 = vmax.f32 %v784_v26, %v1094_v27  ;;  %v388_v30 = vpop.f32.mrf.mxu0  ;;  %v718_v31 = vpop.f32.mrf.mxu1 }
 0x1cf   :  { %v785_v37 = vmax.f32 %v388_v30, %v718_v31 }
 0x1d0   :  { %v1542_v33 = vmax.f32 %v1163_v29, %v1473_v28 }
 0x1d2   :  { %v1595_v34 = vadd.f32 %v2593_v53, %v1542_v33 }
 0x1d4   :  { %v1644_v36 = vmax.f32 %v1595_v34, 0.0 }
 0x1d5   :  { %v1097_v38 = vpop.f32.mrf.mxu2  ;;  %v1476_v39 = vpop.f32.mrf.mxu3 }
 0x1d6   :  { %v2371_v40 = vpack.c.bf16 %v1644_v36, %v1643_v35  ;;  %v390_v41 = vpop.f32.mrf.mxu0  ;;  %v720_v42 = vpop.f32.mrf.mxu1  ;;  %v1164_v43 = vmax.f32 %v785_v37, %v1097_v38 }
 0x1d7   :  { %v786_v45 = vmax.f32 %v390_v41, %v720_v42 }
 0x1d8   :  { %2415 = vst [vmem:[%s2922_s6 + $0x90] sm:$0xff] %v2371_v40   ;;  %v1543_v44 = vmax.f32 %v1164_v43, %v1476_v39 }
 0x1da   :  { %v1596_v51 = vadd.f32 %v2885_v50, %v1543_v44 }
 0x1dc   :  { %v1645_v55 = vmax.f32 %v1596_v51, 0.0 }
 0x1dd   :  { %v1099_v46 = vpop.f32.mrf.mxu2  ;;  %v1478_v47 = vpop.f32.mrf.mxu3 }
 0x1de   :  { %v1165_v48 = vmax.f32 %v786_v45, %v1099_v46  ;;  %v393_v49 = vpop.f32.mrf.mxu0  ;;  %v723_v53 = vpop.f32.mrf.mxu1 }
 0x1df   :  { %v787_v57 = vmax.f32 %v393_v49, %v723_v53 }
 0x1e0   :  { %v1544_v52 = vmax.f32 %v1165_v48, %v1478_v47 }
 0x1e2   :  { %v1597_v54 = vadd.f32 %v2885_v50, %v1544_v52 }
 0x1e4   :  { %v1646_v56 = vmax.f32 %v1597_v54, 0.0 }
 0x1e5   :  { %v1102_v58 = vpop.f32.mrf.mxu2  ;;  %v1481_v59 = vpop.f32.mrf.mxu3 }
 0x1e6   :  { %v2376_v60 = vpack.c.bf16 %v1646_v56, %v1645_v55  ;;  %v395_v61 = vpop.f32.mrf.mxu0  ;;  %v725_v62 = vpop.f32.mrf.mxu1  ;;  %v1166_v63 = vmax.f32 %v787_v57, %v1102_v58 }
 0x1e7   :  { %v788_v1 = vmax.f32 %v395_v61, %v725_v62 }
 0x1e8   :  { %2416 = vst [vmem:[%s2922_s6 + $0x98] sm:$0xff] %v2376_v60   ;;  %v1545_v0 = vmax.f32 %v1166_v63, %v1481_v59 }
 0x1ea   :  { %v1598_v7 = vadd.f32 %v2885_v50, %v1545_v0 }
 0x1ec   :  { %v1647_v10 = vmax.f32 %v1598_v7, 0.0 }
 0x1ed   :  { %v1104_v2 = vpop.f32.mrf.mxu2  ;;  %v1483_v3 = vpop.f32.mrf.mxu3 }
 0x1ee   :  { %v1167_v4 = vmax.f32 %v788_v1, %v1104_v2  ;;  %v398_v5 = vpop.f32.mrf.mxu0  ;;  %v728_v6 = vpop.f32.mrf.mxu1 }
 0x1ef   :  { %v789_v12 = vmax.f32 %v398_v5, %v728_v6 }
 0x1f0   :  { %v1546_v8 = vmax.f32 %v1167_v4, %v1483_v3 }
 0x1f2   :  { %v1599_v9 = vadd.f32 %v2885_v50, %v1546_v8 }
 0x1f4   :  { %v1648_v11 = vmax.f32 %v1599_v9, 0.0 }
 0x1f5   :  { %v1107_v13 = vpop.f32.mrf.mxu2  ;;  %v1486_v14 = vpop.f32.mrf.mxu3 }
 0x1f6   :  { %v2381_v15 = vpack.c.bf16 %v1648_v11, %v1647_v10  ;;  %v400_v16 = vpop.f32.mrf.mxu0  ;;  %v730_v17 = vpop.f32.mrf.mxu1  ;;  %v1168_v18 = vmax.f32 %v789_v12, %v1107_v13 }
 0x1f7   :  { %v790_v20 = vmax.f32 %v400_v16, %v730_v17 }
 0x1f8   :  { %2417 = vst [vmem:[%s2922_s6 + $0xa0] sm:$0xff] %v2381_v15   ;;  %v1547_v19 = vmax.f32 %v1168_v18, %v1486_v14 }
 0x1fa   :  { %v1600_v26 = vadd.f32 %v2885_v50, %v1547_v19 }
 0x1fc   :  { %v1649_v29 = vmax.f32 %v1600_v26, 0.0 }
 0x1fd   :  { %v1109_v21 = vpop.f32.mrf.mxu2  ;;  %v1488_v22 = vpop.f32.mrf.mxu3 }
 0x1fe   :  { %v1169_v23 = vmax.f32 %v790_v20, %v1109_v21  ;;  %v403_v24 = vpop.f32.mrf.mxu0  ;;  %v733_v25 = vpop.f32.mrf.mxu1 }
 0x1ff   :  { %v791_v31 = vmax.f32 %v403_v24, %v733_v25 }
 0x200   :  { %v1548_v27 = vmax.f32 %v1169_v23, %v1488_v22 }
 0x202   :  { %v1601_v28 = vadd.f32 %v2885_v50, %v1548_v27 }
 0x204   :  { %v1650_v30 = vmax.f32 %v1601_v28, 0.0 }
 0x205   :  { %v1112_v32 = vpop.f32.mrf.mxu2  ;;  %v1491_v33 = vpop.f32.mrf.mxu3 }
 0x206   :  { %v2386_v34 = vpack.c.bf16 %v1650_v30, %v1649_v29  ;;  %v405_v35 = vpop.f32.mrf.mxu0  ;;  %v735_v36 = vpop.f32.mrf.mxu1  ;;  %v1170_v37 = vmax.f32 %v791_v31, %v1112_v32 }
 0x207   :  { %v792_v39 = vmax.f32 %v405_v35, %v735_v36 }
 0x208   :  { %2418 = vst [vmem:[%s2922_s6 + $0xa8] sm:$0xff] %v2386_v34   ;;  %v1549_v38 = vmax.f32 %v1170_v37, %v1491_v33 }
 0x20a   :  { %v1602_v45 = vadd.f32 %v2885_v50, %v1549_v38 }
 0x20c   :  { %v1651_v48 = vmax.f32 %v1602_v45, 0.0 }
 0x20d   :  { %v1114_v40 = vpop.f32.mrf.mxu2  ;;  %v1493_v41 = vpop.f32.mrf.mxu3 }
 0x20e   :  { %v1171_v42 = vmax.f32 %v792_v39, %v1114_v40  ;;  %v408_v43 = vpop.f32.mrf.mxu0  ;;  %v738_v44 = vpop.f32.mrf.mxu1 }
 0x20f   :  { %v793_v53 = vmax.f32 %v408_v43, %v738_v44 }
 0x210   :  { %v1550_v46 = vmax.f32 %v1171_v42, %v1493_v41 }
 0x212   :  { %v1603_v47 = vadd.f32 %v2885_v50, %v1550_v46 }
 0x214   :  { %v1652_v49 = vmax.f32 %v1603_v47, 0.0 }
 0x215   :  { %v1117_v51 = vpop.f32.mrf.mxu2  ;;  %v1496_v52 = vpop.f32.mrf.mxu3 }
 0x216   :  { %v2391_v54 = vpack.c.bf16 %v1652_v49, %v1651_v48  ;;  %v410_v55 = vpop.f32.mrf.mxu0  ;;  %v740_v56 = vpop.f32.mrf.mxu1  ;;  %v1172_v57 = vmax.f32 %v793_v53, %v1117_v51 }
 0x217   :  { %v794_v59 = vmax.f32 %v410_v55, %v740_v56 }
 0x218   :  { %2419 = vst [vmem:[%s2922_s6 + $0xb0] sm:$0xff] %v2391_v54   ;;  %v1551_v58 = vmax.f32 %v1172_v57, %v1496_v52 }
 0x21a   :  { %v1604_v1 = vadd.f32 %v2885_v50, %v1551_v58 }
 0x21c   :  { %v1653_v5 = vmax.f32 %v1604_v1, 0.0 }
 0x21d   :  { %v1119_v60 = vpop.f32.mrf.mxu2  ;;  %v1498_v61 = vpop.f32.mrf.mxu3 }
 0x21e   :  { %v1173_v62 = vmax.f32 %v794_v59, %v1119_v60  ;;  %v413_v63 = vpop.f32.mrf.mxu0  ;;  %v743_v0 = vpop.f32.mrf.mxu1 }
 0x21f   :  { %v795_v4 = vmax.f32 %v413_v63, %v743_v0 }
 0x220   :  { %v1552_v2 = vmax.f32 %v1173_v62, %v1498_v61 }
 0x222   :  { %v1605_v3 = vadd.f32 %v2885_v50, %v1552_v2 }
 0x224   :  { %v1654_v6 = vmax.f32 %v1605_v3, 0.0 }
 0x225   :  { %v1122_v7 = vpop.f32.mrf.mxu2  ;;  %v1501_v8 = vpop.f32.mrf.mxu3 }
 0x226   :  { %v2396_v9 = vpack.c.bf16 %v1654_v6, %v1653_v5  ;;  %v1174_v10 = vmax.f32 %v795_v4, %v1122_v7  ;;  %v415_v11 = vpop.f32.mrf.mxu0  ;;  %v745_v12 = vpop.f32.mrf.mxu1 }
 0x228   :  { %2420 = vst [vmem:[%s2922_s6 + $0xb8] sm:$0xff] %v2396_v9   ;;  %v1553_v13 = vmax.f32 %v1174_v10, %v1501_v8 }
 0x22a   :  { %v1606_v14 = vadd.f32 %v2885_v50, %v1553_v13 }
 0x22c   :  { %v1655_v15 = vmax.f32 %v1606_v14, 0.0 }
 0x22d   :  { %v1124_v16 = vpop.f32.mrf.mxu2  ;;  %v1503_v17 = vpop.f32.mrf.mxu3 }
 0x22e   :  { %v1704_v18 = vpack.c.bf16 %v1655_v15, %v1655_v15 }
 0x230   :  { %1753 = vst [vmem:[%s2922_s6 + $0xc0] sm:$0xf] %v1704_v18 }

// kernel: lenet5_vgg_forward.4
= control target key start
LH: loop header
LB: loop body
LE: loop exit
PB: predicated region body
PF: predicated region fallthrough
CT: control target
= control target key end

     0   :  { %s1221_s4 = inlined_call_operand.vmem [shape: bf16[256,128], index: 4, kind: input, shape index: {}]   ;;  %s1222_s0 = inlined_call_operand.vmem [shape: bf16[56,256], index: 0, kind: input, shape index: {}]   ;;  %s1223_s1 = inlined_call_operand.vmem [shape: bf16[56,256], index: 1, kind: input, shape index: {}]   ;;  %s1224_s2 = inlined_call_operand.vmem [shape: bf16[56,256], index: 2, kind: input, shape index: {}]   ;;  %s1225_s3 = inlined_call_operand.vmem [shape: bf16[56,256], index: 3, kind: input, shape index: {}]   ;;  %s1226_s5 = inlined_call_operand.vmem [shape: f32[1,128], index: 5, kind: input, shape index: {}]   ;;  %s1227_s6 = inlined_call_operand.vmem [shape: bf16[56,128], index: 6, kind: output, shape index: {}]  }
   0x1   :  { %v864_v0 = vld [vmem:[%s1221_s4 + $0x38] sm:$0xff]  ;;  %v876_v2 = vld [vmem:[%s1221_s4 + $0x30] sm:$0xff]  ;;  %v890_v4 = vld [vmem:[%s1221_s4 + $0x28] sm:$0xff] }
   0x2   :  { %v869_v1 = vld [vmem:[%s1221_s4 + $0x78] sm:$0xff]  ;;  %195 = vmatpush.bf16.msra.mxu0 %v864_v0  ;;  %v881_v3 = vld [vmem:[%s1221_s4 + $0x70] sm:$0xff]  ;;  %295 = vmatpush.bf16.msra.mxu2 %v864_v0  ;;  %v895_v5 = vld [vmem:[%s1221_s4 + $0x68] sm:$0xff] }
   0x3   :  { %223 = vmatpush.bf16.msra.mxu1 %v869_v1  ;;  %323 = vmatpush.bf16.msra.mxu3 %v869_v1  ;;  %v904_v6 = vld [vmem:[%s1221_s4 + $0x20] sm:$0xff]  ;;  %v918_v8 = vld [vmem:[%s1221_s4 + $0x18] sm:$0xff]  ;;  %v932_v10 = vld [vmem:[%s1221_s4 + $0x10] sm:$0xff] }
   0x4   :  { %v909_v7 = vld [vmem:[%s1221_s4 + $0x60] sm:$0xff]  ;;  %v923_v9 = vld [vmem:[%s1221_s4 + $0x58] sm:$0xff]  ;;  %v937_v11 = vld [vmem:[%s1221_s4 + $0x50] sm:$0xff] }
   0x5   :  { %v946_v12 = vld [vmem:[%s1221_s4 + $0x8] sm:$0xff]  ;;  %v958_v14 = vld [vmem:[%s1221_s4] sm:$0xff]  ;;  %v618_v28 = vld [vmem:[%s1222_s0 + $0x10] sm:$0xf] }
   0x6   :  { %196 = vmatpush.bf16.msra.mxu0 %v876_v2  ;;  %296 = vmatpush.bf16.msra.mxu2 %v876_v2  ;;  %v951_v13 = vld [vmem:[%s1221_s4 + $0x48] sm:$0xff]  ;;  %v963_v15 = vld [vmem:[%s1221_s4 + $0x40] sm:$0xff]  ;;  %v787_v29 = vld [vmem:[%s1222_s0 + $0x14] sm:$0xf0] }
   0x7   :  { %224 = vmatpush.bf16.msra.mxu1 %v881_v3  ;;  %324 = vmatpush.bf16.msra.mxu3 %v881_v3  ;;  %v610_v16 = vld [vmem:[%s1222_s0] sm:$0xf]  ;;  %v785_v17 = vld [vmem:[%s1222_s0 + $0x4] sm:$0xf0]  ;;  %v784_v18 = vld [vmem:[%s1222_s0 + $0x4] sm:$0xf]  ;;  %v619_v36 = vor.u32 %v787_v29, %v618_v28 }
   0x8   :  { %v612_v19 = vld [vmem:[%s1222_s0 + $0x8] sm:$0xf0]  ;;  %v698_v20 = vld [vmem:[%s1223_s1] sm:$0xf]  ;;  %v791_v21 = vld [vmem:[%s1223_s1 + $0x4] sm:$0xf0]  ;;  %v611_v24 = vor.u32 %v785_v17, %v610_v16 }
   0x9   :  { %v790_v22 = vld [vmem:[%s1223_s1 + $0x4] sm:$0xf]  ;;  %v700_v23 = vld [vmem:[%s1223_s1 + $0x8] sm:$0xf0]  ;;  %v615_v25 = vor.u32 %v784_v18, %v612_v19  ;;  %v699_v26 = vor.u32 %v791_v21, %v698_v20  ;;  %v786_v30 = vld [vmem:[%s1222_s0 + $0x14] sm:$0xf] }
   0xa   :  { %197 = vmatpush.bf16.msra.mxu0 %v890_v4  ;;  %297 = vmatpush.bf16.msra.mxu2 %v890_v4  ;;  %v703_v27 = vor.u32 %v790_v22, %v700_v23  ;;  %v620_v31 = vld [vmem:[%s1222_s0 + $0x18] sm:$0xf0]  ;;  %v706_v32 = vld [vmem:[%s1223_s1 + $0x10] sm:$0xf]  ;;  %v793_v33 = vld [vmem:[%s1223_s1 + $0x14] sm:$0xf0] }
   0xb   :  { %225 = vmatpush.bf16.msra.mxu1 %v895_v5  ;;  %325 = vmatpush.bf16.msra.mxu3 %v895_v5  ;;  %v792_v34 = vld [vmem:[%s1223_s1 + $0x14] sm:$0xf]  ;;  %v708_v35 = vld [vmem:[%s1223_s1 + $0x18] sm:$0xf0]  ;;  %v623_v37 = vor.u32 %v786_v30, %v620_v31  ;;  %v707_v38 = vor.u32 %v793_v33, %v706_v32  ;;  %v626_v40 = vld [vmem:[%s1222_s0 + $0x20] sm:$0xf] }
   0xc   :  { %v711_v39 = vor.u32 %v792_v34, %v708_v35  ;;  %v789_v41 = vld [vmem:[%s1222_s0 + $0x24] sm:$0xf0]  ;;  %v788_v42 = vld [vmem:[%s1222_s0 + $0x24] sm:$0xf]  ;;  %v628_v43 = vld [vmem:[%s1222_s0 + $0x28] sm:$0xf0] }
   0xd   :  { %v714_v44 = vld [vmem:[%s1223_s1 + $0x20] sm:$0xf]  ;;  %v795_v45 = vld [vmem:[%s1223_s1 + $0x24] sm:$0xf0]  ;;  %v794_v46 = vld [vmem:[%s1223_s1 + $0x24] sm:$0xf]  ;;  %v627_v48 = vor.u32 %v789_v41, %v626_v40  ;;  %v631_v49 = vor.u32 %v788_v42, %v628_v43 }
   0xe   :  { %198 = vmatpush.bf16.msra.mxu0 %v904_v6  ;;  %298 = vmatpush.bf16.msra.mxu2 %v904_v6  ;;  %v716_v47 = vld [vmem:[%s1223_s1 + $0x28] sm:$0xf0]  ;;  %v715_v50 = vor.u32 %v795_v45, %v714_v44  ;;  %v61_v52 = vld [vmem:[%s1222_s0 + $0x30] sm:$0xff]  ;;  %v722_v62 = vld [vmem:[%s1224_s2] sm:$0xf] }
   0xf   :  { %226 = vmatpush.bf16.msra.mxu1 %v909_v7  ;;  %326 = vmatpush.bf16.msra.mxu3 %v909_v7  ;;  %v719_v51 = vor.u32 %v794_v46, %v716_v47  ;;  %v257_v53 = vld [vmem:[%s1223_s1 + $0x30] sm:$0xff]  ;;  %v81_v54 = vunpack.c.l.b16 %v61_v52  ;;  %v82_v55 = vunpack.c.h.b16 %v61_v52  ;;  %v797_v63 = vld [vmem:[%s1224_s2 + $0x4] sm:$0xf0]  ;;  %v756_v17 = vld [vmem:[%s1225_s3 + $0x18] sm:$0xf0] }
  0x10   :  { %v277_v56 = vunpack.c.l.b16 %v257_v53  ;;  %v278_v57 = vunpack.c.h.b16 %v257_v53  ;;  %v804_v16 = vld [vmem:[%s1225_s3 + $0x14] sm:$0xf]  ;;  %v738_v22 = vld [vmem:[%s1224_s2 + $0x20] sm:$0xf]  ;;  %v801_v23 = vld [vmem:[%s1224_s2 + $0x24] sm:$0xf0] }
  0x11   :  { %v89_v58 = vpack.c.b16 %v81_v54, %v81_v54  ;;  %v90_v59 = vpack.c.b16 %v82_v55, %v82_v55  ;;  %v759_v21 = vor.u32 %v804_v16, %v756_v17  ;;  %v806_v28 = vld [vmem:[%s1225_s3 + $0x24] sm:$0xf]  ;;  %v764_v29 = vld [vmem:[%s1225_s3 + $0x28] sm:$0xf0]  ;;  %v739_v30 = vor.u32 %v801_v23, %v738_v22  ;;  %v364_v34 = vld [vmem:[%s1224_s2 + $0x30] sm:$0xff] }
  0x12   :  { %199 = vmatpush.bf16.msra.mxu0 %v918_v8  ;;  %299 = vmatpush.bf16.msra.mxu2 %v918_v8  ;;  %v285_v60 = vpack.c.b16 %v277_v56, %v277_v56  ;;  %v286_v61 = vpack.c.b16 %v278_v57, %v278_v57  ;;  %v767_v33 = vor.u32 %v806_v28, %v764_v29  ;;  %v471_v35 = vld [vmem:[%s1225_s3 + $0x30] sm:$0xff] }
  0x13   :  { %227 = vmatpush.bf16.msra.mxu1 %v923_v9  ;;  %327 = vmatpush.bf16.msra.mxu3 %v923_v9 }
  0x16   :  { %200 = vmatpush.bf16.msra.mxu0 %v932_v10  ;;  %300 = vmatpush.bf16.msra.mxu2 %v932_v10 }
  0x17   :  { %228 = vmatpush.bf16.msra.mxu1 %v937_v11  ;;  %328 = vmatpush.bf16.msra.mxu3 %v937_v11 }
  0x1a   :  { %201 = vmatpush.bf16.msra.mxu0 %v946_v12  ;;  %301 = vmatpush.bf16.msra.mxu2 %v946_v12 }
  0x1b   :  { %229 = vmatpush.bf16.msra.mxu1 %v951_v13  ;;  %329 = vmatpush.bf16.msra.mxu3 %v951_v13 }
  0x1e   :  { %202 = vmatpush.bf16.msra.mxu0 %v958_v14  ;;  %302 = vmatpush.bf16.msra.mxu2 %v958_v14 }
  0x1f   :  { %230 = vmatpush.bf16.msra.mxu1 %v963_v15  ;;  %330 = vmatpush.bf16.msra.mxu3 %v963_v15 }
  0x21   :  { %203 = vmatmul.bf16.vlgmr.msra.gmra.mxu0 %v611_v24  ;;  %303 = vmatmul.bf16.vlgmr.msra.gmra.mxu2 %v699_v26  ;;  %v800_v24 = vld [vmem:[%s1224_s2 + $0x24] sm:$0xf]  ;;  %v762_v26 = vld [vmem:[%s1225_s3 + $0x20] sm:$0xf] }
  0x22   :  { %509 = vmatpush.bf16.msrb.mxu2 %v864_v0  ;;  %231 = vmatmul.bf16.vlgmr.msra.gmra.mxu1 %v615_v25  ;;  %v740_v25 = vld [vmem:[%s1224_s2 + $0x28] sm:$0xf0] }
  0x23   :  { %537 = vmatpush.bf16.msrb.mxu3 %v869_v1  ;;  %402 = vmatpush.bf16.msrb.mxu0 %v864_v0  ;;  %v796_v0 = vld [vmem:[%s1224_s2 + $0x4] sm:$0xf]  ;;  %v743_v31 = vor.u32 %v800_v24, %v740_v25 }
  0x24   :  { %331 = vmatmul.bf16.vlgmr.msra.gmra.mxu3 %v703_v27  ;;  %430 = vmatpush.bf16.msrb.mxu1 %v869_v1  ;;  %v724_v1 = vld [vmem:[%s1224_s2 + $0x8] sm:$0xf0]  ;;  %v807_v27 = vld [vmem:[%s1225_s3 + $0x24] sm:$0xf0] }
  0x25   :  { %v763_v32 = vor.u32 %v807_v27, %v762_v26 }
  0x26   :  { %510 = vmatpush.bf16.msrb.mxu2 %v876_v2 }
  0x27   :  { %538 = vmatpush.bf16.msrb.mxu3 %v881_v3  ;;  %403 = vmatpush.bf16.msrb.mxu0 %v876_v2  ;;  %v746_v2 = vld [vmem:[%s1225_s3] sm:$0xf] }
  0x28   :  { %431 = vmatpush.bf16.msrb.mxu1 %v881_v3  ;;  %v803_v3 = vld [vmem:[%s1225_s3 + $0x4] sm:$0xf0] }
  0x2a   :  { %511 = vmatpush.bf16.msrb.mxu2 %v890_v4 }
  0x2b   :  { %539 = vmatpush.bf16.msrb.mxu3 %v895_v5  ;;  %404 = vmatpush.bf16.msrb.mxu0 %v890_v4  ;;  %v802_v4 = vld [vmem:[%s1225_s3 + $0x4] sm:$0xf] }
  0x2c   :  { %432 = vmatpush.bf16.msrb.mxu1 %v895_v5  ;;  %v748_v5 = vld [vmem:[%s1225_s3 + $0x8] sm:$0xf0] }
  0x2e   :  { %512 = vmatpush.bf16.msrb.mxu2 %v904_v6 }
  0x2f   :  { %540 = vmatpush.bf16.msrb.mxu3 %v909_v7  ;;  %405 = vmatpush.bf16.msrb.mxu0 %v904_v6  ;;  %v723_v6 = vor.u32 %v797_v63, %v722_v62 }
  0x30   :  { %433 = vmatpush.bf16.msrb.mxu1 %v909_v7  ;;  %v727_v7 = vor.u32 %v796_v0, %v724_v1 }
  0x31   :  { %208 = vmatmul.bf16.gmra.mxu0 %v619_v36  ;;  %308 = vmatmul.bf16.gmra.mxu2 %v707_v38  ;;  %v384_v36 = vunpack.c.l.b16 %v364_v34  ;;  %v491_v38 = vunpack.c.l.b16 %v471_v35 }
  0x32   :  { %513 = vmatpush.bf16.msrb.mxu2 %v918_v8  ;;  %236 = vmatmul.bf16.gmra.mxu1 %v623_v37  ;;  %v385_v37 = vunpack.c.h.b16 %v364_v34 }
  0x33   :  { %541 = vmatpush.bf16.msrb.mxu3 %v923_v9  ;;  %406 = vmatpush.bf16.msrb.mxu0 %v918_v8  ;;  %v747_v8 = vor.u32 %v803_v3, %v746_v2  ;;  %v392_v40 = vpack.c.b16 %v384_v36, %v384_v36  ;;  %v499_v42 = vpack.c.b16 %v491_v38, %v491_v38  ;;  %v1190_v38 = vld [vmem:[%s1226_s5] ss:$0 sm:$0xff] }
  0x34   :  { %336 = vmatmul.bf16.gmra.mxu3 %v711_v39  ;;  %434 = vmatpush.bf16.msrb.mxu1 %v923_v9  ;;  %v751_v9 = vor.u32 %v802_v4, %v748_v5  ;;  %v492_v39 = vunpack.c.h.b16 %v471_v35  ;;  %v393_v41 = vpack.c.b16 %v385_v37, %v385_v37 }
  0x36   :  { %514 = vmatpush.bf16.msrb.mxu2 %v932_v10  ;;  %v500_v43 = vpack.c.b16 %v492_v39, %v492_v39 }
  0x37   :  { %542 = vmatpush.bf16.msrb.mxu3 %v937_v11  ;;  %407 = vmatpush.bf16.msrb.mxu0 %v932_v10  ;;  %v730_v10 = vld [vmem:[%s1224_s2 + $0x10] sm:$0xf] }
  0x38   :  { %435 = vmatpush.bf16.msrb.mxu1 %v937_v11  ;;  %v799_v11 = vld [vmem:[%s1224_s2 + $0x14] sm:$0xf0] }
  0x39   :  { %v731_v18 = vor.u32 %v799_v11, %v730_v10 }
  0x3a   :  { %515 = vmatpush.bf16.msrb.mxu2 %v946_v12 }
  0x3b   :  { %543 = vmatpush.bf16.msrb.mxu3 %v951_v13  ;;  %408 = vmatpush.bf16.msrb.mxu0 %v946_v12  ;;  %v798_v12 = vld [vmem:[%s1224_s2 + $0x14] sm:$0xf] }
  0x3c   :  { %436 = vmatpush.bf16.msrb.mxu1 %v951_v13  ;;  %v732_v13 = vld [vmem:[%s1224_s2 + $0x18] sm:$0xf0] }
  0x3d   :  { %v735_v19 = vor.u32 %v798_v12, %v732_v13 }
  0x3e   :  { %516 = vmatpush.bf16.msrb.mxu2 %v958_v14 }
  0x3f   :  { %544 = vmatpush.bf16.msrb.mxu3 %v963_v15  ;;  %409 = vmatpush.bf16.msrb.mxu0 %v958_v14  ;;  %v754_v14 = vld [vmem:[%s1225_s3 + $0x10] sm:$0xf] }
  0x40   :  { %437 = vmatpush.bf16.msrb.mxu1 %v963_v15  ;;  %v805_v15 = vld [vmem:[%s1225_s3 + $0x14] sm:$0xf0] }
  0x41   :  { %213 = vmatmul.bf16.gmra.mxu0 %v627_v48  ;;  %313 = vmatmul.bf16.gmra.mxu2 %v715_v50  ;;  %v755_v20 = vor.u32 %v805_v15, %v754_v14 }
  0x42   :  { %241 = vmatmul.bf16.gmra.mxu1 %v631_v49 }
  0x44   :  { %341 = vmatmul.bf16.gmra.mxu3 %v719_v51 }
  0x51   :  { %218 = vmatmul.bf16.gmra.mxu0 %v89_v58  ;;  %318 = vmatmul.bf16.gmra.mxu2 %v285_v60 }
  0x52   :  { %246 = vmatmul.bf16.gmra.mxu1 %v90_v59 }
  0x54   :  { %346 = vmatmul.bf16.gmra.mxu3 %v286_v61 }
  0x61   :  { %410 = vmatmul.bf16.vlgmr.msrb.gmra.mxu0 %v723_v6  ;;  %517 = vmatmul.bf16.vlgmr.msrb.gmra.mxu2 %v747_v8 }
  0x62   :  { %438 = vmatmul.bf16.vlgmr.msrb.gmra.mxu1 %v727_v7 }
  0x64   :  { %545 = vmatmul.bf16.vlgmr.msrb.gmra.mxu3 %v751_v9 }
  0x71   :  { %415 = vmatmul.bf16.gmra.mxu0 %v731_v18  ;;  %522 = vmatmul.bf16.gmra.mxu2 %v755_v20 }
  0x72   :  { %443 = vmatmul.bf16.gmra.mxu1 %v735_v19 }
  0x74   :  { %550 = vmatmul.bf16.gmra.mxu3 %v759_v21 }
  0x81   :  { %420 = vmatmul.bf16.gmra.mxu0 %v739_v30  ;;  %527 = vmatmul.bf16.gmra.mxu2 %v763_v32 }
  0x82   :  { %448 = vmatmul.bf16.gmra.mxu1 %v743_v31 }
  0x84   :  { %555 = vmatmul.bf16.gmra.mxu3 %v767_v33 }
  0x91   :  { %425 = vmatmul.bf16.gmra.mxu0 %v392_v40  ;;  %532 = vmatmul.bf16.gmra.mxu2 %v499_v42 }
  0x92   :  { %453 = vmatmul.bf16.gmra.mxu1 %v393_v41 }
  0x94   :  { %560 = vmatmul.bf16.gmra.mxu3 %v500_v43 }
  0x9e   :  { %v204_v44 = vpop.f32.mrf.mxu0 }
  0x9f   :  { %v232_v45 = vpop.f32.mrf.mxu1 }
  0xa0   :  { %v233_v46 = vadd.f32 %v232_v45, %v204_v44 }
  0xa4   :  { %v304_v47 = vpop.f32.mrf.mxu2 }
  0xa6   :  { %v206_v50 = vpop.f32.mrf.mxu0 }
  0xa7   :  { %v332_v48 = vpop.f32.mrf.mxu3  ;;  %v234_v51 = vpop.f32.mrf.mxu1 }
  0xa8   :  { %v333_v49 = vadd.f32 %v332_v48, %v304_v47  ;;  %v235_v52 = vadd.f32 %v234_v51, %v206_v50 }
  0xaa   :  { %v351_v53 = vmax.f32 %v233_v46, %v333_v49 }
  0xac   :  { %v306_v54 = vpop.f32.mrf.mxu2 }
  0xae   :  { %v209_v56 = vpop.f32.mrf.mxu0 }
  0xaf   :  { %v334_v55 = vpop.f32.mrf.mxu3  ;;  %v237_v57 = vpop.f32.mrf.mxu1 }
  0xb0   :  { %v1161_v58 = vadd.f32 %v237_v57, %v209_v56  ;;  %v335_v32 = vadd.f32 %v334_v55, %v306_v54 }
  0xb2   :  { %v352_v36 = vmax.f32 %v235_v52, %v335_v32 }
  0xb4   :  { %v309_v59 = vpop.f32.mrf.mxu2 }
  0xb6   :  { %v211_v62 = vpop.f32.mrf.mxu0 }
  0xb7   :  { %v337_v60 = vpop.f32.mrf.mxu3  ;;  %v239_v63 = vpop.f32.mrf.mxu1 }
  0xb8   :  { %v1163_v61 = vadd.f32 %v337_v60, %v309_v59  ;;  %v1165_v0 = vadd.f32 %v239_v63, %v211_v62 }
  0xba   :  { %v353_v1 = vmax.f32 %v1161_v58, %v1163_v61 }
  0xbc   :  { %v311_v2 = vpop.f32.mrf.mxu2 }
  0xbe   :  { %v214_v4 = vpop.f32.mrf.mxu0 }
  0xbf   :  { %v339_v3 = vpop.f32.mrf.mxu3  ;;  %v242_v5 = vpop.f32.mrf.mxu1 }
  0xc0   :  { %v1169_v6 = vadd.f32 %v242_v5, %v214_v4  ;;  %v340_v56 = vadd.f32 %v339_v3, %v311_v2 }
  0xc2   :  { %v354_v60 = vmax.f32 %v1165_v0, %v340_v56 }
  0xc4   :  { %v314_v7 = vpop.f32.mrf.mxu2 }
  0xc6   :  { %v216_v10 = vpop.f32.mrf.mxu0 }
  0xc7   :  { %v342_v8 = vpop.f32.mrf.mxu3  ;;  %v244_v11 = vpop.f32.mrf.mxu1 }
  0xc8   :  { %v1171_v9 = vadd.f32 %v342_v8, %v314_v7  ;;  %v1173_v12 = vadd.f32 %v244_v11, %v216_v10 }
  0xca   :  { %v355_v13 = vmax.f32 %v1169_v6, %v1171_v9 }
  0xcc   :  { %v1177_v14 = vpop.f32.mrf.mxu2 }
  0xce   :  { %v219_v16 = vpop.f32.mrf.mxu0 }
  0xcf   :  { %v1179_v15 = vpop.f32.mrf.mxu3  ;;  %v247_v17 = vpop.f32.mrf.mxu1 }
  0xd0   :  { %v1181_v18 = vadd.f32 %v247_v17, %v219_v16 }
  0xd4   :  { %v1183_v19 = vpop.f32.mrf.mxu2 }
  0xd6   :  { %v221_v21 = vpop.f32.mrf.mxu0 }
  0xd7   :  { %v1185_v20 = vpop.f32.mrf.mxu3  ;;  %v249_v22 = vpop.f32.mrf.mxu1 }
  0xdc   :  { %v321_v23 = vpop.f32.mrf.mxu2 }
  0xde   :  { %v411_v25 = vpop.f32.mrf.mxu0 }
  0xdf   :  { %v349_v24 = vpop.f32.mrf.mxu3  ;;  %v439_v26 = vpop.f32.mrf.mxu1 }
  0xe0   :  { %v440_v29 = vadd.f32 %v439_v26, %v411_v25  ;;  %v345_v24 = vadd.f32 %v1179_v15, %v1177_v14  ;;  %v348_v14 = vadd.f32 %v1185_v20, %v1183_v19 }
  0xe2   :  { %v458_v34 = vmax.f32 %v351_v53, %v440_v29  ;;  %v357_v9 = vmax.f32 %v1181_v18, %v348_v14 }
  0xe4   :  { %v518_v27 = vpop.f32.mrf.mxu2 }
  0xe6   :  { %v413_v30 = vpop.f32.mrf.mxu0 }
  0xe7   :  { %v546_v28 = vpop.f32.mrf.mxu3  ;;  %v441_v31 = vpop.f32.mrf.mxu1 }
  0xe8   :  { %v547_v33 = vadd.f32 %v546_v28, %v518_v27  ;;  %v442_v35 = vadd.f32 %v441_v31, %v413_v30  ;;  %v356_v28 = vmax.f32 %v1173_v12, %v345_v24 }
  0xea   :  { %v565_v37 = vmax.f32 %v458_v34, %v547_v33  ;;  %v459_v41 = vmax.f32 %v352_v36, %v442_v35 }
  0xec   :  { %v520_v39 = vpop.f32.mrf.mxu2  ;;  %v576_v45 = vadd.f32 %v1190_v38, %v565_v37 }
  0xee   :  { %v416_v43 = vpop.f32.mrf.mxu0  ;;  %v583_v48 = vmax.f32 %v576_v45, 0.0 }
  0xef   :  { %v548_v40 = vpop.f32.mrf.mxu3  ;;  %v444_v44 = vpop.f32.mrf.mxu1 }
  0xf0   :  { %v549_v42 = vadd.f32 %v548_v40, %v520_v39  ;;  %v445_v53 = vadd.f32 %v444_v44, %v416_v43 }
  0xf2   :  { %v566_v46 = vmax.f32 %v459_v41, %v549_v42  ;;  %v460_v58 = vmax.f32 %v353_v1, %v445_v53 }
  0xf4   :  { %v577_v47 = vadd.f32 %v1190_v38, %v566_v46  ;;  %v523_v50 = vpop.f32.mrf.mxu2 }
  0xf6   :  { %v584_v49 = vmax.f32 %v577_v47, 0.0  ;;  %v418_v54 = vpop.f32.mrf.mxu0 }
  0xf7   :  { %v551_v51 = vpop.f32.mrf.mxu3  ;;  %v446_v55 = vpop.f32.mrf.mxu1 }
  0xf8   :  { %v811_v52 = vpack.c.bf16 %v584_v49, %v583_v48  ;;  %v552_v57 = vadd.f32 %v551_v51, %v523_v50  ;;  %v447_v59 = vadd.f32 %v446_v55, %v418_v54 }
  0xfa   :  { %812 = vst [vmem:[%s1227_s6] sm:$0xff] %v811_v52   ;;  %v567_v61 = vmax.f32 %v460_v58, %v552_v57  ;;  %v461_v4 = vmax.f32 %v354_v60, %v447_v59 }
  0xfc   :  { %v525_v62 = vpop.f32.mrf.mxu2  ;;  %v578_v10 = vadd.f32 %v1190_v38, %v567_v61 }
  0xfe   :  { %v421_v7 = vpop.f32.mrf.mxu0  ;;  %v585_v3 = vmax.f32 %v578_v10, 0.0 }
  0xff   :  { %v553_v63 = vpop.f32.mrf.mxu3  ;;  %v449_v8 = vpop.f32.mrf.mxu1 }
 0x100   :  { %v554_v5 = vadd.f32 %v553_v63, %v525_v62  ;;  %v450_v22 = vadd.f32 %v449_v8, %v421_v7 }
 0x102   :  { %v568_v11 = vmax.f32 %v461_v4, %v554_v5  ;;  %v462_v26 = vmax.f32 %v355_v13, %v450_v22 }
 0x104   :  { %v579_v2 = vadd.f32 %v1190_v38, %v568_v11  ;;  %v528_v17 = vpop.f32.mrf.mxu2 }
 0x106   :  { %v586_v16 = vmax.f32 %v579_v2, 0.0  ;;  %v423_v23 = vpop.f32.mrf.mxu0 }
 0x107   :  { %v556_v21 = vpop.f32.mrf.mxu3  ;;  %v451_v0 = vpop.f32.mrf.mxu1 }
 0x108   :  { %v816_v1 = vpack.c.bf16 %v586_v16, %v585_v3  ;;  %v557_v25 = vadd.f32 %v556_v21, %v528_v17  ;;  %v452_v27 = vadd.f32 %v451_v0, %v423_v23 }
 0x10a   :  { %823 = vst [vmem:[%s1227_s6 + $0x8] sm:$0xff] %v816_v1   ;;  %v569_v29 = vmax.f32 %v462_v26, %v557_v25  ;;  %v463_v32 = vmax.f32 %v356_v28, %v452_v27 }
 0x10c   :  { %v530_v30 = vpop.f32.mrf.mxu2  ;;  %v580_v15 = vadd.f32 %v1190_v38, %v569_v29 }
 0x10e   :  { %v426_v34 = vpop.f32.mrf.mxu0  ;;  %v587_v13 = vmax.f32 %v580_v15, 0.0 }
 0x10f   :  { %v558_v31 = vpop.f32.mrf.mxu3  ;;  %v454_v35 = vpop.f32.mrf.mxu1 }
 0x110   :  { %v559_v33 = vadd.f32 %v558_v31, %v530_v30  ;;  %v455_v6 = vadd.f32 %v454_v35, %v426_v34 }
 0x112   :  { %v570_v36 = vmax.f32 %v463_v32, %v559_v33  ;;  %v464_v42 = vmax.f32 %v357_v9, %v455_v6 }
 0x114   :  { %v581_v37 = vadd.f32 %v1190_v38, %v570_v36  ;;  %v533_v39 = vpop.f32.mrf.mxu2 }
 0x116   :  { %v588_v12 = vmax.f32 %v581_v37, 0.0  ;;  %v428_v44 = vpop.f32.mrf.mxu0 }
 0x117   :  { %v561_v40 = vpop.f32.mrf.mxu3  ;;  %v456_v45 = vpop.f32.mrf.mxu1 }
 0x118   :  { %v821_v41 = vpack.c.bf16 %v588_v12, %v587_v13  ;;  %v562_v43 = vadd.f32 %v561_v40, %v533_v39 }
 0x11a   :  { %824 = vst [vmem:[%s1227_s6 + $0x10] sm:$0xff] %v821_v41   ;;  %v571_v19 = vmax.f32 %v464_v42, %v562_v43 }
 0x11c   :  { %v582_v20 = vadd.f32 %v1190_v38, %v571_v19  ;;  %v535_v47 = vpop.f32.mrf.mxu2 }
 0x11e   :  { %v589_v46 = vmax.f32 %v582_v20, 0.0 }
 0x11f   :  { %v563_v48 = vpop.f32.mrf.mxu3 }
 0x120   :  { %v596_v18 = vpack.c.bf16 %v589_v46, %v589_v46 }
 0x122   :  { %603 = vst [vmem:[%s1227_s6 + $0x18] sm:$0xf] %v596_v18 }

// kernel: lenet5_vgg_forward.5
= control target key start
LH: loop header
LB: loop body
LE: loop exit
PB: predicated region body
PF: predicated region fallthrough
CT: control target
= control target key end

     0   :  { %s4049_s1 = inlined_call_operand.vmem [shape: bf16[3200,128], index: 1, kind: input, shape index: {}]   ;;  %s4050_s0 = inlined_call_operand.vmem [shape: bf16[8,3200], index: 0, kind: input, shape index: {}]   ;;  %s4051_s2 = inlined_call_operand.vmem [shape: f32[1,128], index: 2, kind: input, shape index: {}]   ;;  %s4052_s4 = inlined_call_operand.vmem [shape: f32[1,128], index: 4, kind: input, shape index: {}]   ;;  %s4053_s3 = inlined_call_operand.vmem [shape: bf16[128,128], index: 3, kind: input, shape index: {}]   ;;  %s4054_s5 = inlined_call_operand.vmem [shape: bf16[128,128], index: 5, kind: input, shape index: {}]   ;;  %s4055_s6 = inlined_call_operand.vmem [shape: f32[1,128], index: 6, kind: input, shape index: {}]   ;;  %s4056_s7 = inlined_call_operand.vmem [shape: f32[8,128], index: 7, kind: output, shape index: {}]  }
   0x1   :  { %v3098_v0 = vld [vmem:[%s4049_s1 + $0x38] sm:$0xff]  ;;  %v3097_v4 = vld [vmem:[%s4049_s1 + $0x30] sm:$0xff]  ;;  %v3096_v8 = vld [vmem:[%s4049_s1 + $0x28] sm:$0xff] }
   0x2   :  { %v3114_v1 = vld [vmem:[%s4049_s1 + $0xb8] sm:$0xff]  ;;  %1731 = vmatpush.bf16.msra.mxu0 %v3098_v0  ;;  %v3113_v5 = vld [vmem:[%s4049_s1 + $0xb0] sm:$0xff]  ;;  %v3112_v9 = vld [vmem:[%s4049_s1 + $0xa8] sm:$0xff] }
   0x3   :  { %v3106_v2 = vld [vmem:[%s4049_s1 + $0x78] sm:$0xff]  ;;  %1757 = vmatpush.bf16.msra.mxu2 %v3114_v1  ;;  %v3105_v6 = vld [vmem:[%s4049_s1 + $0x70] sm:$0xff]  ;;  %v3104_v10 = vld [vmem:[%s4049_s1 + $0x68] sm:$0xff] }
   0x4   :  { %v3122_v3 = vld [vmem:[%s4049_s1 + $0xf8] sm:$0xff]  ;;  %1744 = vmatpush.bf16.msra.mxu1 %v3106_v2  ;;  %v3121_v7 = vld [vmem:[%s4049_s1 + $0xf0] sm:$0xff]  ;;  %v3120_v11 = vld [vmem:[%s4049_s1 + $0xe8] sm:$0xff] }
   0x5   :  { %1770 = vmatpush.bf16.msra.mxu3 %v3122_v3  ;;  %v3095_v12 = vld [vmem:[%s4049_s1 + $0x20] sm:$0xff]  ;;  %v3094_v16 = vld [vmem:[%s4049_s1 + $0x18] sm:$0xff]  ;;  %v3093_v20 = vld [vmem:[%s4049_s1 + $0x10] sm:$0xff] }
   0x6   :  { %1732 = vmatpush.bf16.msra.mxu0 %v3097_v4  ;;  %v3111_v13 = vld [vmem:[%s4049_s1 + $0xa0] sm:$0xff]  ;;  %v3110_v17 = vld [vmem:[%s4049_s1 + $0x98] sm:$0xff]  ;;  %v3109_v21 = vld [vmem:[%s4049_s1 + $0x90] sm:$0xff] }
   0x7   :  { %1758 = vmatpush.bf16.msra.mxu2 %v3113_v5  ;;  %v3103_v14 = vld [vmem:[%s4049_s1 + $0x60] sm:$0xff]  ;;  %v3102_v18 = vld [vmem:[%s4049_s1 + $0x58] sm:$0xff]  ;;  %v3101_v22 = vld [vmem:[%s4049_s1 + $0x50] sm:$0xff] }
   0x8   :  { %1745 = vmatpush.bf16.msra.mxu1 %v3105_v6  ;;  %v3119_v15 = vld [vmem:[%s4049_s1 + $0xe0] sm:$0xff]  ;;  %v3118_v19 = vld [vmem:[%s4049_s1 + $0xd8] sm:$0xff]  ;;  %v3117_v23 = vld [vmem:[%s4049_s1 + $0xd0] sm:$0xff] }
   0x9   :  { %1771 = vmatpush.bf16.msra.mxu3 %v3121_v7  ;;  %v3092_v24 = vld [vmem:[%s4049_s1 + $0x8] sm:$0xff]  ;;  %v26_v29 = vld [vmem:[%s4050_s0] sm:$0xff]  ;;  %v3130_v34 = vld [vmem:[%s4049_s1 + $0x138] sm:$0xff] }
   0xa   :  { %1733 = vmatpush.bf16.msra.mxu0 %v3096_v8  ;;  %v3108_v25 = vld [vmem:[%s4049_s1 + $0x88] sm:$0xff]  ;;  %v3091_v30 = vld [vmem:[%s4049_s1] sm:$0xff]  ;;  %v456_v33 = vunpack.c.l.b16 %v26_v29  ;;  %v3146_v35 = vld [vmem:[%s4049_s1 + $0x1b8] sm:$0xff]  ;;  %v457_v39 = vunpack.c.h.b16 %v26_v29 }
   0xb   :  { %1759 = vmatpush.bf16.msra.mxu2 %v3112_v9  ;;  %v3100_v26 = vld [vmem:[%s4049_s1 + $0x48] sm:$0xff]  ;;  %v3107_v31 = vld [vmem:[%s4049_s1 + $0x80] sm:$0xff]  ;;  %v3138_v40 = vld [vmem:[%s4049_s1 + $0x178] sm:$0xff] }
   0xc   :  { %1746 = vmatpush.bf16.msra.mxu1 %v3104_v10  ;;  %v3116_v27 = vld [vmem:[%s4049_s1 + $0xc8] sm:$0xff]  ;;  %v3099_v36 = vld [vmem:[%s4049_s1 + $0x40] sm:$0xff]  ;;  %v3154_v41 = vld [vmem:[%s4049_s1 + $0x1f8] sm:$0xff]  ;;  %v481_v43 = vpack.c.b16 %v456_v33, %v456_v33  ;;  %v482_v47 = vpack.c.b16 %v457_v39, %v457_v39 }
   0xd   :  { %1772 = vmatpush.bf16.msra.mxu3 %v3120_v11  ;;  %v27_v28 = vld [vmem:[%s4050_s0 + $0x8] sm:$0xff]  ;;  %v3115_v37 = vld [vmem:[%s4049_s1 + $0xc0] sm:$0xff]  ;;  %v3129_v44 = vld [vmem:[%s4049_s1 + $0x130] sm:$0xff] }
   0xe   :  { %1734 = vmatpush.bf16.msra.mxu0 %v3095_v12  ;;  %v458_v32 = vunpack.c.l.b16 %v27_v28  ;;  %v459_v38 = vunpack.c.h.b16 %v27_v28  ;;  %v3145_v45 = vld [vmem:[%s4049_s1 + $0x1b0] sm:$0xff]  ;;  %v3128_v50 = vld [vmem:[%s4049_s1 + $0x128] sm:$0xff]  ;;  %v3127_v54 = vld [vmem:[%s4049_s1 + $0x120] sm:$0xff] }
   0xf   :  { %1760 = vmatpush.bf16.msra.mxu2 %v3111_v13  ;;  %v3137_v48 = vld [vmem:[%s4049_s1 + $0x170] sm:$0xff]  ;;  %v3144_v51 = vld [vmem:[%s4049_s1 + $0x1a8] sm:$0xff]  ;;  %v3143_v55 = vld [vmem:[%s4049_s1 + $0x1a0] sm:$0xff] }
  0x10   :  { %1747 = vmatpush.bf16.msra.mxu1 %v3103_v14  ;;  %v483_v42 = vpack.c.b16 %v458_v32, %v458_v32  ;;  %v484_v46 = vpack.c.b16 %v459_v38, %v459_v38  ;;  %v3153_v49 = vld [vmem:[%s4049_s1 + $0x1f0] sm:$0xff]  ;;  %v3136_v52 = vld [vmem:[%s4049_s1 + $0x168] sm:$0xff]  ;;  %v3135_v56 = vld [vmem:[%s4049_s1 + $0x160] sm:$0xff] }
  0x11   :  { %1773 = vmatpush.bf16.msra.mxu3 %v3119_v15  ;;  %v3152_v53 = vld [vmem:[%s4049_s1 + $0x1e8] sm:$0xff]  ;;  %v3151_v57 = vld [vmem:[%s4049_s1 + $0x1e0] sm:$0xff]  ;;  %v3126_v58 = vld [vmem:[%s4049_s1 + $0x118] sm:$0xff] }
  0x12   :  { %1735 = vmatpush.bf16.msra.mxu0 %v3094_v16  ;;  %v3142_v59 = vld [vmem:[%s4049_s1 + $0x198] sm:$0xff]  ;;  %v3125_v62 = vld [vmem:[%s4049_s1 + $0x110] sm:$0xff]  ;;  %v3124_v2 = vld [vmem:[%s4049_s1 + $0x108] sm:$0xff] }
  0x13   :  { %1761 = vmatpush.bf16.msra.mxu2 %v3110_v17  ;;  %v3134_v60 = vld [vmem:[%s4049_s1 + $0x158] sm:$0xff]  ;;  %v3141_v63 = vld [vmem:[%s4049_s1 + $0x190] sm:$0xff]  ;;  %v3140_v3 = vld [vmem:[%s4049_s1 + $0x188] sm:$0xff] }
  0x14   :  { %1748 = vmatpush.bf16.msra.mxu1 %v3102_v18  ;;  %v3150_v61 = vld [vmem:[%s4049_s1 + $0x1d8] sm:$0xff]  ;;  %v3133_v0 = vld [vmem:[%s4049_s1 + $0x150] sm:$0xff]  ;;  %v3132_v6 = vld [vmem:[%s4049_s1 + $0x148] sm:$0xff] }
  0x15   :  { %1774 = vmatpush.bf16.msra.mxu3 %v3118_v19  ;;  %v3149_v1 = vld [vmem:[%s4049_s1 + $0x1d0] sm:$0xff]  ;;  %v29_v4 = vld [vmem:[%s4050_s0 + $0x18] sm:$0xff]  ;;  %v3148_v7 = vld [vmem:[%s4049_s1 + $0x1c8] sm:$0xff] }
  0x16   :  { %1736 = vmatpush.bf16.msra.mxu0 %v3093_v20  ;;  %v28_v5 = vld [vmem:[%s4050_s0 + $0x10] sm:$0xff]  ;;  %v3123_v8 = vld [vmem:[%s4049_s1 + $0x100] sm:$0xff]  ;;  %v462_v10 = vunpack.c.l.b16 %v29_v4  ;;  %v3162_v12 = vld [vmem:[%s4049_s1 + $0x238] sm:$0xff]  ;;  %v463_v16 = vunpack.c.h.b16 %v29_v4 }
  0x17   :  { %1762 = vmatpush.bf16.msra.mxu2 %v3109_v21  ;;  %v3139_v9 = vld [vmem:[%s4049_s1 + $0x180] sm:$0xff]  ;;  %v460_v11 = vunpack.c.l.b16 %v28_v5  ;;  %v3178_v13 = vld [vmem:[%s4049_s1 + $0x2b8] sm:$0xff]  ;;  %v461_v17 = vunpack.c.h.b16 %v28_v5  ;;  %v3160_v28 = vld [vmem:[%s4049_s1 + $0x228] sm:$0xff] }
  0x18   :  { %1749 = vmatpush.bf16.msra.mxu1 %v3101_v22  ;;  %v3131_v14 = vld [vmem:[%s4049_s1 + $0x140] sm:$0xff]  ;;  %v3170_v18 = vld [vmem:[%s4049_s1 + $0x278] sm:$0xff]  ;;  %v487_v20 = vpack.c.b16 %v462_v10, %v462_v10  ;;  %v3161_v22 = vld [vmem:[%s4049_s1 + $0x230] sm:$0xff] }
  0x19   :  { %1775 = vmatpush.bf16.msra.mxu3 %v3117_v23  ;;  %v3147_v15 = vld [vmem:[%s4049_s1 + $0x1c0] sm:$0xff]  ;;  %v3186_v19 = vld [vmem:[%s4049_s1 + $0x2f8] sm:$0xff]  ;;  %v485_v21 = vpack.c.b16 %v460_v11, %v460_v11  ;;  %v3177_v23 = vld [vmem:[%s4049_s1 + $0x2b0] sm:$0xff] }
  0x1a   :  { %1737 = vmatpush.bf16.msra.mxu0 %v3092_v24  ;;  %v488_v24 = vpack.c.b16 %v463_v16, %v463_v16  ;;  %v3176_v29 = vld [vmem:[%s4049_s1 + $0x2a8] sm:$0xff]  ;;  %v3159_v32 = vld [vmem:[%s4049_s1 + $0x220] sm:$0xff]  ;;  %v3166_v38 = vld [vmem:[%s4049_s1 + $0x258] sm:$0xff] }
  0x1b   :  { %1763 = vmatpush.bf16.msra.mxu2 %v3108_v25  ;;  %v486_v25 = vpack.c.b16 %v461_v17, %v461_v17  ;;  %v3175_v33 = vld [vmem:[%s4049_s1 + $0x2a0] sm:$0xff]  ;;  %v3182_v39 = vld [vmem:[%s4049_s1 + $0x2d8] sm:$0xff]  ;;  %v3201_v4 = vld [vmem:[%s4049_s1 + $0x370] sm:$0xff] }
  0x1c   :  { %1750 = vmatpush.bf16.msra.mxu1 %v3100_v26  ;;  %v3169_v26 = vld [vmem:[%s4049_s1 + $0x270] sm:$0xff]  ;;  %v3191_v10 = vld [vmem:[%s4049_s1 + $0x320] sm:$0xff]  ;;  %v3198_v16 = vld [vmem:[%s4049_s1 + $0x358] sm:$0xff] }
  0x1d   :  { %1776 = vmatpush.bf16.msra.mxu3 %v3116_v27  ;;  %v3185_v27 = vld [vmem:[%s4049_s1 + $0x2f0] sm:$0xff]  ;;  %v3207_v11 = vld [vmem:[%s4049_s1 + $0x3a0] sm:$0xff]  ;;  %v3214_v17 = vld [vmem:[%s4049_s1 + $0x3d8] sm:$0xff] }
  0x1e   :  { %1738 = vmatpush.bf16.msra.mxu0 %v3091_v30  ;;  %v3168_v30 = vld [vmem:[%s4049_s1 + $0x268] sm:$0xff]  ;;  %v3217_v5 = vld [vmem:[%s4049_s1 + $0x3f0] sm:$0xff] }
  0x1f   :  { %1764 = vmatpush.bf16.msra.mxu2 %v3107_v31  ;;  %v3184_v31 = vld [vmem:[%s4049_s1 + $0x2e8] sm:$0xff] }
  0x20   :  { %1751 = vmatpush.bf16.msra.mxu1 %v3099_v36  ;;  %v3158_v36 = vld [vmem:[%s4049_s1 + $0x218] sm:$0xff] }
  0x21   :  { %1777 = vmatpush.bf16.msra.mxu3 %v3115_v37  ;;  %1739 = vmatmul.bf16.vlgmr.msra.gmra.mxu0 %v481_v43  ;;  %v3174_v37 = vld [vmem:[%s4049_s1 + $0x298] sm:$0xff]  ;;  %v3181_v43 = vld [vmem:[%s4049_s1 + $0x2d0] sm:$0xff] }
  0x22   :  { %1783 = vmatpush.bf16.msrb.mxu0 %v3130_v34  ;;  %1765 = vmatmul.bf16.vlgmr.msra.gmra.mxu2 %v483_v42  ;;  %v3167_v34 = vld [vmem:[%s4049_s1 + $0x260] sm:$0xff]  ;;  %v3165_v42 = vld [vmem:[%s4049_s1 + $0x250] sm:$0xff] }
  0x23   :  { %1809 = vmatpush.bf16.msrb.mxu2 %v3146_v35  ;;  %1752 = vmatmul.bf16.vlgmr.msra.gmra.mxu1 %v482_v47  ;;  %v3183_v35 = vld [vmem:[%s4049_s1 + $0x2e0] sm:$0xff]  ;;  %v31_v47 = vld [vmem:[%s4050_s0 + $0x28] sm:$0xff] }
  0x24   :  { %1796 = vmatpush.bf16.msrb.mxu1 %v3138_v40  ;;  %1778 = vmatmul.bf16.vlgmr.msra.gmra.mxu3 %v484_v46  ;;  %v3157_v40 = vld [vmem:[%s4049_s1 + $0x210] sm:$0xff]  ;;  %v30_v46 = vld [vmem:[%s4050_s0 + $0x20] sm:$0xff] }
  0x25   :  { %1822 = vmatpush.bf16.msrb.mxu3 %v3154_v41  ;;  %v3173_v41 = vld [vmem:[%s4049_s1 + $0x290] sm:$0xff] }
  0x26   :  { %1784 = vmatpush.bf16.msrb.mxu0 %v3129_v44  ;;  %v3156_v44 = vld [vmem:[%s4049_s1 + $0x208] sm:$0xff] }
  0x27   :  { %1810 = vmatpush.bf16.msrb.mxu2 %v3145_v45  ;;  %v3172_v45 = vld [vmem:[%s4049_s1 + $0x288] sm:$0xff] }
  0x28   :  { %1797 = vmatpush.bf16.msrb.mxu1 %v3137_v48  ;;  %v3164_v48 = vld [vmem:[%s4049_s1 + $0x248] sm:$0xff] }
  0x29   :  { %1823 = vmatpush.bf16.msrb.mxu3 %v3153_v49  ;;  %v3180_v49 = vld [vmem:[%s4049_s1 + $0x2c8] sm:$0xff] }
  0x2a   :  { %1785 = vmatpush.bf16.msrb.mxu0 %v3128_v50  ;;  %v464_v50 = vunpack.c.l.b16 %v30_v46 }
  0x2b   :  { %1811 = vmatpush.bf16.msrb.mxu2 %v3144_v51  ;;  %v466_v51 = vunpack.c.l.b16 %v31_v47 }
  0x2c   :  { %1798 = vmatpush.bf16.msrb.mxu1 %v3136_v52  ;;  %v3155_v52 = vld [vmem:[%s4049_s1 + $0x200] sm:$0xff] }
  0x2d   :  { %1824 = vmatpush.bf16.msrb.mxu3 %v3152_v53  ;;  %v3171_v53 = vld [vmem:[%s4049_s1 + $0x280] sm:$0xff] }
  0x2e   :  { %1786 = vmatpush.bf16.msrb.mxu0 %v3127_v54  ;;  %v3194_v54 = vld [vmem:[%s4049_s1 + $0x338] sm:$0xff] }
  0x2f   :  { %1812 = vmatpush.bf16.msrb.mxu2 %v3143_v55  ;;  %v3210_v55 = vld [vmem:[%s4049_s1 + $0x3b8] sm:$0xff] }
  0x30   :  { %1799 = vmatpush.bf16.msrb.mxu1 %v3135_v56  ;;  %v465_v56 = vunpack.c.h.b16 %v30_v46  ;;  %v3233_v46 = vld [vmem:[%s4049_s1 + $0x470] sm:$0xff] }
  0x31   :  { %1825 = vmatpush.bf16.msrb.mxu3 %v3151_v57  ;;  %v467_v57 = vunpack.c.h.b16 %v31_v47  ;;  %v3249_v47 = vld [vmem:[%s4049_s1 + $0x4f0] sm:$0xff] }
  0x32   :  { %1787 = vmatpush.bf16.msrb.mxu0 %v3126_v58  ;;  %v3163_v58 = vld [vmem:[%s4049_s1 + $0x240] sm:$0xff] }
  0x33   :  { %1813 = vmatpush.bf16.msrb.mxu2 %v3142_v59  ;;  %v3179_v59 = vld [vmem:[%s4049_s1 + $0x2c0] sm:$0xff] }
  0x34   :  { %1800 = vmatpush.bf16.msrb.mxu1 %v3134_v60  ;;  %v489_v60 = vpack.c.b16 %v464_v50, %v464_v50  ;;  %v3232_v50 = vld [vmem:[%s4049_s1 + $0x468] sm:$0xff] }
  0x35   :  { %1826 = vmatpush.bf16.msrb.mxu3 %v3150_v61  ;;  %v491_v61 = vpack.c.b16 %v466_v51, %v466_v51  ;;  %v3248_v51 = vld [vmem:[%s4049_s1 + $0x4e8] sm:$0xff] }
  0x36   :  { %1788 = vmatpush.bf16.msrb.mxu0 %v3125_v62  ;;  %v3202_v62 = vld [vmem:[%s4049_s1 + $0x378] sm:$0xff] }
  0x37   :  { %1814 = vmatpush.bf16.msrb.mxu2 %v3141_v63  ;;  %v3218_v63 = vld [vmem:[%s4049_s1 + $0x3f8] sm:$0xff] }
  0x38   :  { %1801 = vmatpush.bf16.msrb.mxu1 %v3133_v0  ;;  %v490_v0 = vpack.c.b16 %v465_v56, %v465_v56  ;;  %v3222_v56 = vld [vmem:[%s4049_s1 + $0x418] sm:$0xff] }
  0x39   :  { %1827 = vmatpush.bf16.msrb.mxu3 %v3149_v1  ;;  %v492_v1 = vpack.c.b16 %v467_v57, %v467_v57  ;;  %v3238_v57 = vld [vmem:[%s4049_s1 + $0x498] sm:$0xff] }
  0x3a   :  { %1789 = vmatpush.bf16.msrb.mxu0 %v3124_v2  ;;  %v3193_v2 = vld [vmem:[%s4049_s1 + $0x330] sm:$0xff] }
  0x3b   :  { %1815 = vmatpush.bf16.msrb.mxu2 %v3140_v3  ;;  %v3209_v3 = vld [vmem:[%s4049_s1 + $0x3b0] sm:$0xff] }
  0x3c   :  { %1802 = vmatpush.bf16.msrb.mxu1 %v3132_v6  ;;  %v3192_v6 = vld [vmem:[%s4049_s1 + $0x328] sm:$0xff] }
  0x3d   :  { %1828 = vmatpush.bf16.msrb.mxu3 %v3148_v7  ;;  %v3208_v7 = vld [vmem:[%s4049_s1 + $0x3a8] sm:$0xff] }
  0x3e   :  { %1790 = vmatpush.bf16.msrb.mxu0 %v3123_v8  ;;  %v3200_v8 = vld [vmem:[%s4049_s1 + $0x368] sm:$0xff] }
  0x3f   :  { %1816 = vmatpush.bf16.msrb.mxu2 %v3139_v9  ;;  %v3216_v9 = vld [vmem:[%s4049_s1 + $0x3e8] sm:$0xff] }
  0x40   :  { %1803 = vmatpush.bf16.msrb.mxu1 %v3131_v14  ;;  %v3190_v14 = vld [vmem:[%s4049_s1 + $0x318] sm:$0xff] }
  0x41   :  { %1829 = vmatpush.bf16.msrb.mxu3 %v3147_v15  ;;  %1791 = vmatmul.bf16.vlgmr.msrb.gmra.mxu0 %v485_v21  ;;  %v3206_v15 = vld [vmem:[%s4049_s1 + $0x398] sm:$0xff]  ;;  %v3213_v21 = vld [vmem:[%s4049_s1 + $0x3d0] sm:$0xff] }
  0x42   :  { %1835 = vmatpush.bf16.msra.mxu0 %v3162_v12  ;;  %1817 = vmatmul.bf16.vlgmr.msrb.gmra.mxu2 %v487_v20  ;;  %v3199_v12 = vld [vmem:[%s4049_s1 + $0x360] sm:$0xff]  ;;  %v3197_v20 = vld [vmem:[%s4049_s1 + $0x350] sm:$0xff] }
  0x43   :  { %1861 = vmatpush.bf16.msra.mxu2 %v3178_v13  ;;  %1804 = vmatmul.bf16.vlgmr.msrb.gmra.mxu1 %v486_v25  ;;  %v3215_v13 = vld [vmem:[%s4049_s1 + $0x3e0] sm:$0xff]  ;;  %v33_v25 = vld [vmem:[%s4050_s0 + $0x38] sm:$0xff] }
  0x44   :  { %1848 = vmatpush.bf16.msra.mxu1 %v3170_v18  ;;  %1830 = vmatmul.bf16.vlgmr.msrb.gmra.mxu3 %v488_v24  ;;  %v3189_v18 = vld [vmem:[%s4049_s1 + $0x310] sm:$0xff] }
  0x45   :  { %1874 = vmatpush.bf16.msra.mxu3 %v3186_v19  ;;  %v3205_v19 = vld [vmem:[%s4049_s1 + $0x390] sm:$0xff] }
  0x46   :  { %1836 = vmatpush.bf16.msra.mxu0 %v3161_v22  ;;  %v3188_v22 = vld [vmem:[%s4049_s1 + $0x308] sm:$0xff]  ;;  %v32_v24 = vld [vmem:[%s4050_s0 + $0x30] sm:$0xff] }
  0x47   :  { %1862 = vmatpush.bf16.msra.mxu2 %v3177_v23  ;;  %v3204_v23 = vld [vmem:[%s4049_s1 + $0x388] sm:$0xff] }
  0x48   :  { %1849 = vmatpush.bf16.msra.mxu1 %v3169_v26  ;;  %v3196_v26 = vld [vmem:[%s4049_s1 + $0x348] sm:$0xff] }
  0x49   :  { %1875 = vmatpush.bf16.msra.mxu3 %v3185_v27  ;;  %v3212_v27 = vld [vmem:[%s4049_s1 + $0x3c8] sm:$0xff] }
  0x4a   :  { %1837 = vmatpush.bf16.msra.mxu0 %v3160_v28  ;;  %v468_v28 = vunpack.c.l.b16 %v32_v24 }
  0x4b   :  { %1863 = vmatpush.bf16.msra.mxu2 %v3176_v29  ;;  %v470_v29 = vunpack.c.l.b16 %v33_v25 }
  0x4c   :  { %1850 = vmatpush.bf16.msra.mxu1 %v3168_v30  ;;  %v3187_v30 = vld [vmem:[%s4049_s1 + $0x300] sm:$0xff] }
  0x4d   :  { %1876 = vmatpush.bf16.msra.mxu3 %v3184_v31  ;;  %v3203_v31 = vld [vmem:[%s4049_s1 + $0x380] sm:$0xff] }
  0x4e   :  { %1838 = vmatpush.bf16.msra.mxu0 %v3159_v32  ;;  %v3226_v32 = vld [vmem:[%s4049_s1 + $0x438] sm:$0xff] }
  0x4f   :  { %1864 = vmatpush.bf16.msra.mxu2 %v3175_v33  ;;  %v3242_v33 = vld [vmem:[%s4049_s1 + $0x4b8] sm:$0xff] }
  0x50   :  { %1851 = vmatpush.bf16.msra.mxu1 %v3167_v34  ;;  %v469_v34 = vunpack.c.h.b16 %v32_v24  ;;  %v3265_v24 = vld [vmem:[%s4049_s1 + $0x570] sm:$0xff] }
  0x51   :  { %1877 = vmatpush.bf16.msra.mxu3 %v3183_v35  ;;  %v471_v35 = vunpack.c.h.b16 %v33_v25  ;;  %v3281_v25 = vld [vmem:[%s4049_s1 + $0x5f0] sm:$0xff] }
  0x52   :  { %1839 = vmatpush.bf16.msra.mxu0 %v3158_v36  ;;  %v3195_v36 = vld [vmem:[%s4049_s1 + $0x340] sm:$0xff] }
  0x53   :  { %1865 = vmatpush.bf16.msra.mxu2 %v3174_v37  ;;  %v3211_v37 = vld [vmem:[%s4049_s1 + $0x3c0] sm:$0xff] }
  0x54   :  { %1852 = vmatpush.bf16.msra.mxu1 %v3166_v38  ;;  %v493_v38 = vpack.c.b16 %v468_v28, %v468_v28  ;;  %v3264_v28 = vld [vmem:[%s4049_s1 + $0x568] sm:$0xff] }
  0x55   :  { %1878 = vmatpush.bf16.msra.mxu3 %v3182_v39  ;;  %v495_v39 = vpack.c.b16 %v470_v29, %v470_v29  ;;  %v3280_v29 = vld [vmem:[%s4049_s1 + $0x5e8] sm:$0xff] }
  0x56   :  { %1840 = vmatpush.bf16.msra.mxu0 %v3157_v40  ;;  %v3234_v40 = vld [vmem:[%s4049_s1 + $0x478] sm:$0xff] }
  0x57   :  { %1866 = vmatpush.bf16.msra.mxu2 %v3173_v41  ;;  %v3250_v41 = vld [vmem:[%s4049_s1 + $0x4f8] sm:$0xff] }
  0x58   :  { %1853 = vmatpush.bf16.msra.mxu1 %v3165_v42  ;;  %v494_v42 = vpack.c.b16 %v469_v34, %v469_v34  ;;  %v3263_v34 = vld [vmem:[%s4049_s1 + $0x560] sm:$0xff] }
  0x59   :  { %1879 = vmatpush.bf16.msra.mxu3 %v3181_v43  ;;  %v496_v43 = vpack.c.b16 %v471_v35, %v471_v35  ;;  %v3279_v35 = vld [vmem:[%s4049_s1 + $0x5e0] sm:$0xff] }
  0x5a   :  { %1841 = vmatpush.bf16.msra.mxu0 %v3156_v44  ;;  %v3225_v44 = vld [vmem:[%s4049_s1 + $0x430] sm:$0xff] }
  0x5b   :  { %1867 = vmatpush.bf16.msra.mxu2 %v3172_v45  ;;  %v3241_v45 = vld [vmem:[%s4049_s1 + $0x4b0] sm:$0xff] }
  0x5c   :  { %1854 = vmatpush.bf16.msra.mxu1 %v3164_v48  ;;  %v3224_v48 = vld [vmem:[%s4049_s1 + $0x428] sm:$0xff] }
  0x5d   :  { %1880 = vmatpush.bf16.msra.mxu3 %v3180_v49  ;;  %v3240_v49 = vld [vmem:[%s4049_s1 + $0x4a8] sm:$0xff] }
  0x5e   :  { %1842 = vmatpush.bf16.msra.mxu0 %v3155_v52  ;;  %v3223_v52 = vld [vmem:[%s4049_s1 + $0x420] sm:$0xff] }
  0x5f   :  { %1868 = vmatpush.bf16.msra.mxu2 %v3171_v53  ;;  %v3239_v53 = vld [vmem:[%s4049_s1 + $0x4a0] sm:$0xff] }
  0x60   :  { %1855 = vmatpush.bf16.msra.mxu1 %v3163_v58  ;;  %v3230_v58 = vld [vmem:[%s4049_s1 + $0x458] sm:$0xff] }
  0x61   :  { %1881 = vmatpush.bf16.msra.mxu3 %v3179_v59  ;;  %1843 = vmatmul.bf16.vlgmr.msra.gmra.mxu0 %v489_v60  ;;  %v3246_v59 = vld [vmem:[%s4049_s1 + $0x4d8] sm:$0xff]  ;;  %v3221_v60 = vld [vmem:[%s4049_s1 + $0x410] sm:$0xff] }
  0x62   :  { %1887 = vmatpush.bf16.msrb.mxu0 %v3194_v54  ;;  %1869 = vmatmul.bf16.vlgmr.msra.gmra.mxu2 %v491_v61  ;;  %v3231_v54 = vld [vmem:[%s4049_s1 + $0x460] sm:$0xff]  ;;  %v3237_v61 = vld [vmem:[%s4049_s1 + $0x490] sm:$0xff] }
  0x63   :  { %1913 = vmatpush.bf16.msrb.mxu2 %v3210_v55  ;;  %1856 = vmatmul.bf16.vlgmr.msra.gmra.mxu1 %v490_v0  ;;  %v3247_v55 = vld [vmem:[%s4049_s1 + $0x4e0] sm:$0xff]  ;;  %v3220_v0 = vld [vmem:[%s4049_s1 + $0x408] sm:$0xff] }
  0x64   :  { %1900 = vmatpush.bf16.msrb.mxu1 %v3202_v62  ;;  %1882 = vmatmul.bf16.vlgmr.msra.gmra.mxu3 %v492_v1  ;;  %v3229_v62 = vld [vmem:[%s4049_s1 + $0x450] sm:$0xff]  ;;  %v3236_v1 = vld [vmem:[%s4049_s1 + $0x488] sm:$0xff] }
  0x65   :  { %1926 = vmatpush.bf16.msrb.mxu3 %v3218_v63  ;;  %v3245_v63 = vld [vmem:[%s4049_s1 + $0x4d0] sm:$0xff] }
  0x66   :  { %1888 = vmatpush.bf16.msrb.mxu0 %v3193_v2  ;;  %v34_v2 = vld [vmem:[%s4050_s0 + $0x40] sm:$0xff] }
  0x67   :  { %1914 = vmatpush.bf16.msrb.mxu2 %v3209_v3  ;;  %v35_v3 = vld [vmem:[%s4050_s0 + $0x48] sm:$0xff] }
  0x68   :  { %1901 = vmatpush.bf16.msrb.mxu1 %v3201_v4  ;;  %v3228_v4 = vld [vmem:[%s4049_s1 + $0x448] sm:$0xff] }
  0x69   :  { %1927 = vmatpush.bf16.msrb.mxu3 %v3217_v5  ;;  %v3244_v5 = vld [vmem:[%s4049_s1 + $0x4c8] sm:$0xff] }
  0x6a   :  { %1889 = vmatpush.bf16.msrb.mxu0 %v3192_v6  ;;  %v472_v6 = vunpack.c.l.b16 %v34_v2 }
  0x6b   :  { %1915 = vmatpush.bf16.msrb.mxu2 %v3208_v7  ;;  %v474_v7 = vunpack.c.l.b16 %v35_v3 }
  0x6c   :  { %1902 = vmatpush.bf16.msrb.mxu1 %v3200_v8  ;;  %v3219_v8 = vld [vmem:[%s4049_s1 + $0x400] sm:$0xff] }
  0x6d   :  { %1928 = vmatpush.bf16.msrb.mxu3 %v3216_v9  ;;  %v3235_v9 = vld [vmem:[%s4049_s1 + $0x480] sm:$0xff] }
  0x6e   :  { %1890 = vmatpush.bf16.msrb.mxu0 %v3191_v10  ;;  %v3258_v10 = vld [vmem:[%s4049_s1 + $0x538] sm:$0xff] }
  0x6f   :  { %1916 = vmatpush.bf16.msrb.mxu2 %v3207_v11  ;;  %v3274_v11 = vld [vmem:[%s4049_s1 + $0x5b8] sm:$0xff] }
  0x70   :  { %1903 = vmatpush.bf16.msrb.mxu1 %v3199_v12  ;;  %v473_v12 = vunpack.c.h.b16 %v34_v2 }
  0x71   :  { %1929 = vmatpush.bf16.msrb.mxu3 %v3215_v13  ;;  %v475_v13 = vunpack.c.h.b16 %v35_v3 }
  0x72   :  { %1891 = vmatpush.bf16.msrb.mxu0 %v3190_v14  ;;  %v3227_v14 = vld [vmem:[%s4049_s1 + $0x440] sm:$0xff] }
  0x73   :  { %1917 = vmatpush.bf16.msrb.mxu2 %v3206_v15  ;;  %v3243_v15 = vld [vmem:[%s4049_s1 + $0x4c0] sm:$0xff] }
  0x74   :  { %1904 = vmatpush.bf16.msrb.mxu1 %v3198_v16  ;;  %v497_v16 = vpack.c.b16 %v472_v6, %v472_v6 }
  0x75   :  { %1930 = vmatpush.bf16.msrb.mxu3 %v3214_v17  ;;  %v499_v17 = vpack.c.b16 %v474_v7, %v474_v7 }
  0x76   :  { %1892 = vmatpush.bf16.msrb.mxu0 %v3189_v18  ;;  %v3266_v18 = vld [vmem:[%s4049_s1 + $0x578] sm:$0xff] }
  0x77   :  { %1918 = vmatpush.bf16.msrb.mxu2 %v3205_v19  ;;  %v3282_v19 = vld [vmem:[%s4049_s1 + $0x5f8] sm:$0xff] }
  0x78   :  { %1905 = vmatpush.bf16.msrb.mxu1 %v3197_v20  ;;  %v498_v20 = vpack.c.b16 %v473_v12, %v473_v12  ;;  %v3287_v12 = vld [vmem:[%s4049_s1 + $0x620] sm:$0xff] }
  0x79   :  { %1931 = vmatpush.bf16.msrb.mxu3 %v3213_v21  ;;  %v500_v21 = vpack.c.b16 %v475_v13, %v475_v13 }
  0x7a   :  { %1893 = vmatpush.bf16.msrb.mxu0 %v3188_v22  ;;  %v3257_v22 = vld [vmem:[%s4049_s1 + $0x530] sm:$0xff] }
  0x7b   :  { %1919 = vmatpush.bf16.msrb.mxu2 %v3204_v23  ;;  %v3273_v23 = vld [vmem:[%s4049_s1 + $0x5b0] sm:$0xff] }
  0x7c   :  { %1906 = vmatpush.bf16.msrb.mxu1 %v3196_v26  ;;  %v3256_v26 = vld [vmem:[%s4049_s1 + $0x528] sm:$0xff] }
  0x7d   :  { %1932 = vmatpush.bf16.msrb.mxu3 %v3212_v27  ;;  %v3272_v27 = vld [vmem:[%s4049_s1 + $0x5a8] sm:$0xff] }
  0x7e   :  { %1894 = vmatpush.bf16.msrb.mxu0 %v3187_v30  ;;  %v3307_v30 = vld [vmem:[%s4051_s2] ss:$0 sm:$0xff] }
  0x7f   :  { %1920 = vmatpush.bf16.msrb.mxu2 %v3203_v31  ;;  %v3255_v31 = vld [vmem:[%s4049_s1 + $0x520] sm:$0xff] }
  0x80   :  { %1907 = vmatpush.bf16.msrb.mxu1 %v3195_v36 }
  0x81   :  { %1933 = vmatpush.bf16.msrb.mxu3 %v3211_v37  ;;  %1895 = vmatmul.bf16.vlgmr.msrb.gmra.mxu0 %v493_v38  ;;  %v3254_v38 = vld [vmem:[%s4049_s1 + $0x518] sm:$0xff] }
  0x82   :  { %1939 = vmatpush.bf16.msra.mxu0 %v3226_v32  ;;  %1921 = vmatmul.bf16.vlgmr.msrb.gmra.mxu2 %v495_v39  ;;  %v3271_v32 = vld [vmem:[%s4049_s1 + $0x5a0] sm:$0xff]  ;;  %v3270_v39 = vld [vmem:[%s4049_s1 + $0x598] sm:$0xff] }
  0x83   :  { %1965 = vmatpush.bf16.msra.mxu2 %v3242_v33  ;;  %1908 = vmatmul.bf16.vlgmr.msrb.gmra.mxu1 %v494_v42  ;;  %v3278_v42 = vld [vmem:[%s4049_s1 + $0x5d8] sm:$0xff] }
  0x84   :  { %1952 = vmatpush.bf16.msra.mxu1 %v3234_v40  ;;  %1934 = vmatmul.bf16.vlgmr.msrb.gmra.mxu3 %v496_v43 }
  0x85   :  { %1978 = vmatpush.bf16.msra.mxu3 %v3250_v41  ;;  %v3262_v41 = vld [vmem:[%s4049_s1 + $0x558] sm:$0xff] }
  0x86   :  { %1940 = vmatpush.bf16.msra.mxu0 %v3225_v44  ;;  %v3253_v44 = vld [vmem:[%s4049_s1 + $0x510] sm:$0xff] }
  0x87   :  { %1966 = vmatpush.bf16.msra.mxu2 %v3241_v45  ;;  %v3269_v45 = vld [vmem:[%s4049_s1 + $0x590] sm:$0xff] }
  0x88   :  { %1953 = vmatpush.bf16.msra.mxu1 %v3233_v46 }
  0x89   :  { %1979 = vmatpush.bf16.msra.mxu3 %v3249_v47 }
  0x8a   :  { %1941 = vmatpush.bf16.msra.mxu0 %v3224_v48 }
  0x8b   :  { %1967 = vmatpush.bf16.msra.mxu2 %v3240_v49  ;;  %v3261_v49 = vld [vmem:[%s4049_s1 + $0x550] sm:$0xff] }
  0x8c   :  { %1954 = vmatpush.bf16.msra.mxu1 %v3232_v50  ;;  %v3277_v50 = vld [vmem:[%s4049_s1 + $0x5d0] sm:$0xff] }
  0x8d   :  { %1980 = vmatpush.bf16.msra.mxu3 %v3248_v51 }
  0x8e   :  { %1942 = vmatpush.bf16.msra.mxu0 %v3223_v52  ;;  %v3252_v52 = vld [vmem:[%s4049_s1 + $0x508] sm:$0xff] }
  0x8f   :  { %1968 = vmatpush.bf16.msra.mxu2 %v3239_v53 }
  0x90   :  { %1955 = vmatpush.bf16.msra.mxu1 %v3231_v54  ;;  %v3268_v54 = vld [vmem:[%s4049_s1 + $0x588] sm:$0xff] }
  0x91   :  { %1981 = vmatpush.bf16.msra.mxu3 %v3247_v55  ;;  %v36_v55 = vld [vmem:[%s4050_s0 + $0x50] sm:$0xff] }
  0x92   :  { %1943 = vmatpush.bf16.msra.mxu0 %v3222_v56  ;;  %v37_v56 = vld [vmem:[%s4050_s0 + $0x58] sm:$0xff] }
  0x93   :  { %1969 = vmatpush.bf16.msra.mxu2 %v3238_v57  ;;  %v3260_v57 = vld [vmem:[%s4049_s1 + $0x548] sm:$0xff]  ;;  %v479_v2 = vunpack.c.h.b16 %v37_v56 }
  0x94   :  { %1956 = vmatpush.bf16.msra.mxu1 %v3230_v58  ;;  %v3276_v58 = vld [vmem:[%s4049_s1 + $0x5c8] sm:$0xff] }
  0x95   :  { %1982 = vmatpush.bf16.msra.mxu3 %v3246_v59  ;;  %v476_v59 = vunpack.c.l.b16 %v36_v55 }
  0x96   :  { %1944 = vmatpush.bf16.msra.mxu0 %v3221_v60  ;;  %v478_v60 = vunpack.c.l.b16 %v37_v56 }
  0x97   :  { %1970 = vmatpush.bf16.msra.mxu2 %v3237_v61  ;;  %v501_v6 = vpack.c.b16 %v476_v59, %v476_v59 }
  0x98   :  { %1957 = vmatpush.bf16.msra.mxu1 %v3229_v62  ;;  %v3251_v62 = vld [vmem:[%s4049_s1 + $0x500] sm:$0xff]  ;;  %v503_v7 = vpack.c.b16 %v478_v60, %v478_v60  ;;  %v3297_v60 = vld [vmem:[%s4053_s3 + $0x30] sm:$0xff] }
  0x99   :  { %1983 = vmatpush.bf16.msra.mxu3 %v3245_v63  ;;  %v3267_v63 = vld [vmem:[%s4049_s1 + $0x580] sm:$0xff] }
  0x9a   :  { %1945 = vmatpush.bf16.msra.mxu0 %v3220_v0  ;;  %v3290_v0 = vld [vmem:[%s4049_s1 + $0x638] sm:$0xff] }
  0x9b   :  { %1971 = vmatpush.bf16.msra.mxu2 %v3236_v1  ;;  %v477_v1 = vunpack.c.h.b16 %v36_v55 }
  0x9c   :  { %1958 = vmatpush.bf16.msra.mxu1 %v3228_v4  ;;  %v3259_v4 = vld [vmem:[%s4049_s1 + $0x540] sm:$0xff] }
  0x9d   :  { %1984 = vmatpush.bf16.msra.mxu3 %v3244_v5  ;;  %v3275_v5 = vld [vmem:[%s4049_s1 + $0x5c0] sm:$0xff] }
  0x9e   :  { %1946 = vmatpush.bf16.msra.mxu0 %v3219_v8  ;;  %v1740_v33 = vpop.f32.mrf.mxu0  ;;  %v502_v8 = vpack.c.b16 %v477_v1, %v477_v1  ;;  %v3295_v1 = vld [vmem:[%s4053_s3 + $0x20] sm:$0xff] }
  0x9f   :  { %1972 = vmatpush.bf16.msra.mxu2 %v3235_v9  ;;  %v1741_v36 = vadd.f32 %v3307_v30, %v1740_v33  ;;  %v504_v9 = vpack.c.b16 %v479_v2, %v479_v2 }
  0xa0   :  { %1959 = vmatpush.bf16.msra.mxu1 %v3227_v14  ;;  %v1753_v37 = vpop.f32.mrf.mxu1 }
  0xa1   :  { %1985 = vmatpush.bf16.msra.mxu3 %v3243_v15  ;;  %1947 = vmatmul.bf16.vlgmr.msra.gmra.mxu0 %v497_v16  ;;  %v1754_v40 = vadd.f32 %v1753_v37, %v1741_v36 }
  0xa2   :  { %1991 = vmatpush.bf16.msrb.mxu0 %v3258_v10  ;;  %1973 = vmatmul.bf16.vlgmr.msra.gmra.mxu2 %v499_v17  ;;  %v3289_v10 = vld [vmem:[%s4049_s1 + $0x630] sm:$0xff]  ;;  %v3286_v17 = vld [vmem:[%s4049_s1 + $0x618] sm:$0xff] }
  0xa3   :  { %2017 = vmatpush.bf16.msrb.mxu2 %v3274_v11  ;;  %1960 = vmatmul.bf16.vlgmr.msra.gmra.mxu1 %v498_v20  ;;  %v3288_v11 = vld [vmem:[%s4049_s1 + $0x628] sm:$0xff]  ;;  %v3285_v20 = vld [vmem:[%s4049_s1 + $0x610] sm:$0xff] }
  0xa4   :  { %2004 = vmatpush.bf16.msrb.mxu1 %v3266_v18  ;;  %1986 = vmatmul.bf16.vlgmr.msra.gmra.mxu3 %v500_v21 }
  0xa5   :  { %2030 = vmatpush.bf16.msrb.mxu3 %v3282_v19  ;;  %v1766_v43 = vpop.f32.mrf.mxu2 }
  0xa6   :  { %1992 = vmatpush.bf16.msrb.mxu0 %v3257_v22  ;;  %v1767_v46 = vadd.f32 %v1766_v43, %v1754_v40  ;;  %v1742_v48 = vpop.f32.mrf.mxu0 }
  0xa7   :  { %2018 = vmatpush.bf16.msrb.mxu2 %v3273_v23  ;;  %v1779_v47 = vpop.f32.mrf.mxu3 }
  0xa8   :  { %2005 = vmatpush.bf16.msrb.mxu1 %v3265_v24  ;;  %v1780_v51 = vadd.f32 %v1779_v47, %v1767_v46  ;;  %v1755_v53 = vpop.f32.mrf.mxu1 }
  0xa9   :  { %2031 = vmatpush.bf16.msrb.mxu3 %v3281_v25  ;;  %v3284_v25 = vld [vmem:[%s4049_s1 + $0x608] sm:$0xff] }
  0xaa   :  { %1993 = vmatpush.bf16.msrb.mxu0 %v3256_v26  ;;  %v38_v26 = vld [vmem:[%s4050_s0 + $0x60] sm:$0xf] }
  0xab   :  { %2019 = vmatpush.bf16.msrb.mxu2 %v3272_v27 }
  0xac   :  { %2006 = vmatpush.bf16.msrb.mxu1 %v3264_v28  ;;  %v480_v28 = vunpack.c.l.b16 %v38_v26 }
  0xad   :  { %2032 = vmatpush.bf16.msrb.mxu3 %v3280_v29  ;;  %v1768_v61 = vpop.f32.mrf.mxu2  ;;  %v3283_v29 = vld [vmem:[%s4049_s1 + $0x600] sm:$0xff] }
  0xae   :  { %1994 = vmatpush.bf16.msrb.mxu0 %v3255_v31  ;;  %v505_v31 = vpack.c.b16 %v480_v28, %v480_v28 }
  0xaf   :  { %2020 = vmatpush.bf16.msrb.mxu2 %v3271_v32  ;;  %v1781_v3 = vpop.f32.mrf.mxu3 }
  0xb0   :  { %2007 = vmatpush.bf16.msrb.mxu1 %v3263_v34 }
  0xb1   :  { %2033 = vmatpush.bf16.msrb.mxu3 %v3279_v35 }
  0xb2   :  { %1995 = vmatpush.bf16.msrb.mxu0 %v3254_v38 }
  0xb3   :  { %2021 = vmatpush.bf16.msrb.mxu2 %v3270_v39 }
  0xb4   :  { %2008 = vmatpush.bf16.msrb.mxu1 %v3262_v41 }
  0xb5   :  { %2034 = vmatpush.bf16.msrb.mxu3 %v3278_v42 }
  0xb6   :  { %1996 = vmatpush.bf16.msrb.mxu0 %v3253_v44 }
  0xb7   :  { %2022 = vmatpush.bf16.msrb.mxu2 %v3269_v45 }
  0xb8   :  { %2009 = vmatpush.bf16.msrb.mxu1 %v3261_v49 }
  0xb9   :  { %2035 = vmatpush.bf16.msrb.mxu3 %v3277_v50 }
  0xba   :  { %1997 = vmatpush.bf16.msrb.mxu0 %v3252_v52 }
  0xbb   :  { %2023 = vmatpush.bf16.msrb.mxu2 %v3268_v54 }
  0xbc   :  { %2010 = vmatpush.bf16.msrb.mxu1 %v3260_v57  ;;  %v3298_v57 = vld [vmem:[%s4053_s3 + $0x38] sm:$0xff] }
  0xbd   :  { %2036 = vmatpush.bf16.msrb.mxu3 %v3276_v58 }
  0xbe   :  { %1998 = vmatpush.bf16.msrb.mxu0 %v3251_v62  ;;  %v1792_v13 = vpop.f32.mrf.mxu0 }
  0xbf   :  { %2024 = vmatpush.bf16.msrb.mxu2 %v3267_v63  ;;  %v1793_v14 = vadd.f32 %v1792_v13, %v1780_v51  ;;  %v3296_v63 = vld [vmem:[%s4053_s3 + $0x28] sm:$0xff] }
  0xc0   :  { %2011 = vmatpush.bf16.msrb.mxu1 %v3259_v4  ;;  %v1805_v15 = vpop.f32.mrf.mxu1  ;;  %v3294_v4 = vld [vmem:[%s4053_s3 + $0x18] sm:$0xff] }
  0xc1   :  { %2037 = vmatpush.bf16.msrb.mxu3 %v3275_v5  ;;  %1999 = vmatmul.bf16.vlgmr.msrb.gmra.mxu0 %v501_v6  ;;  %v1806_v16 = vadd.f32 %v1805_v15, %v1793_v14  ;;  %v3293_v5 = vld [vmem:[%s4053_s3 + $0x10] sm:$0xff]  ;;  %v3292_v6 = vld [vmem:[%s4053_s3 + $0x8] sm:$0xff] }
  0xc2   :  { %2043 = vmatpush.bf16.msra.mxu0 %v3290_v0  ;;  %2025 = vmatmul.bf16.vlgmr.msrb.gmra.mxu2 %v503_v7  ;;  %v3305_v15 = vld [vmem:[%s4054_s5 + $0x30] sm:$0xff] }
  0xc3   :  { %2012 = vmatmul.bf16.vlgmr.msrb.gmra.mxu1 %v502_v8  ;;  %v3291_v8 = vld [vmem:[%s4053_s3] sm:$0xff] }
  0xc4   :  { %2038 = vmatmul.bf16.vlgmr.msrb.gmra.mxu3 %v504_v9  ;;  %2126 = vmatpush.bf16.msra.mxu1 %v3298_v57 }
  0xc5   :  { %v1818_v18 = vpop.f32.mrf.mxu2 }
  0xc6   :  { %2044 = vmatpush.bf16.msra.mxu0 %v3289_v10  ;;  %v1819_v19 = vadd.f32 %v1818_v18, %v1806_v16  ;;  %v1794_v22 = vpop.f32.mrf.mxu0  ;;  %v3304_v18 = vld [vmem:[%s4054_s5 + $0x28] sm:$0xff] }
  0xc7   :  { %v1831_v21 = vpop.f32.mrf.mxu3  ;;  %v3303_v22 = vld [vmem:[%s4054_s5 + $0x20] sm:$0xff] }
  0xc8   :  { %v1832_v23 = vadd.f32 %v1831_v21, %v1819_v19  ;;  %v1807_v24 = vpop.f32.mrf.mxu1  ;;  %2127 = vmatpush.bf16.msra.mxu1 %v3297_v60 }
  0xca   :  { %2045 = vmatpush.bf16.msra.mxu0 %v3288_v11  ;;  %v3306_v11 = vld [vmem:[%s4054_s5 + $0x38] sm:$0xff] }
  0xcb   :  { %2209 = vmatpush.bf16.msra.mxu2 %v3306_v11 }
  0xcc   :  { %2128 = vmatpush.bf16.msra.mxu1 %v3296_v63 }
  0xcd   :  { %v1820_v27 = vpop.f32.mrf.mxu2 }
  0xce   :  { %2046 = vmatpush.bf16.msra.mxu0 %v3287_v12  ;;  %v3301_v27 = vld [vmem:[%s4054_s5 + $0x10] sm:$0xff] }
  0xcf   :  { %v1833_v30 = vpop.f32.mrf.mxu3  ;;  %2210 = vmatpush.bf16.msra.mxu2 %v3305_v15 }
  0xd0   :  { %2129 = vmatpush.bf16.msra.mxu1 %v3295_v1 }
  0xd2   :  { %2047 = vmatpush.bf16.msra.mxu0 %v3286_v17 }
  0xd3   :  { %2211 = vmatpush.bf16.msra.mxu2 %v3304_v18 }
  0xd4   :  { %2130 = vmatpush.bf16.msra.mxu1 %v3294_v4 }
  0xd6   :  { %2048 = vmatpush.bf16.msra.mxu0 %v3285_v20 }
  0xd7   :  { %2212 = vmatpush.bf16.msra.mxu2 %v3303_v22 }
  0xd8   :  { %2131 = vmatpush.bf16.msra.mxu1 %v3293_v5 }
  0xda   :  { %2049 = vmatpush.bf16.msra.mxu0 %v3284_v25  ;;  %v3302_v25 = vld [vmem:[%s4054_s5 + $0x18] sm:$0xff] }
  0xdb   :  { %2213 = vmatpush.bf16.msra.mxu2 %v3302_v25 }
  0xdc   :  { %2132 = vmatpush.bf16.msra.mxu1 %v3292_v6 }
  0xde   :  { %2050 = vmatpush.bf16.msra.mxu0 %v3283_v29  ;;  %v1844_v32 = vpop.f32.mrf.mxu0 }
  0xdf   :  { %v1845_v33 = vadd.f32 %v1844_v32, %v1832_v23  ;;  %2214 = vmatpush.bf16.msra.mxu2 %v3301_v27 }
  0xe0   :  { %v1857_v34 = vpop.f32.mrf.mxu1  ;;  %2133 = vmatpush.bf16.msra.mxu1 %v3291_v8 }
  0xe1   :  { %2051 = vmatmul.bf16.vlgmr.msra.gmra.mxu0 %v505_v31  ;;  %v1858_v35 = vadd.f32 %v1857_v34, %v1845_v33 }
  0xe5   :  { %v1870_v36 = vpop.f32.mrf.mxu2 }
  0xe6   :  { %v1871_v37 = vadd.f32 %v1870_v36, %v1858_v35  ;;  %v1846_v39 = vpop.f32.mrf.mxu0  ;;  %v3300_v35 = vld [vmem:[%s4054_s5 + $0x8] sm:$0xff]  ;;  %v3299_v36 = vld [vmem:[%s4054_s5] sm:$0xff] }
  0xe7   :  { %v1883_v38 = vpop.f32.mrf.mxu3  ;;  %2215 = vmatpush.bf16.msra.mxu2 %v3300_v35 }
  0xe8   :  { %v1884_v40 = vadd.f32 %v1883_v38, %v1871_v37  ;;  %v1859_v41 = vpop.f32.mrf.mxu1  ;;  %v3308_v37 = vld [vmem:[%s4052_s4] ss:$0 sm:$0xff] }
  0xeb   :  { %2216 = vmatpush.bf16.msra.mxu2 %v3299_v36 }
  0xed   :  { %v1872_v42 = vpop.f32.mrf.mxu2 }
  0xef   :  { %v1885_v43 = vpop.f32.mrf.mxu3 }
  0xf0   :  { %v3309_v43 = vld [vmem:[%s4055_s6] ss:$0 sm:$0xff] }
  0xfe   :  { %v1896_v44 = vpop.f32.mrf.mxu0 }
  0xff   :  { %v1897_v45 = vadd.f32 %v1896_v44, %v1884_v40 }
 0x100   :  { %v1909_v46 = vpop.f32.mrf.mxu1 }
 0x101   :  { %v1910_v47 = vadd.f32 %v1909_v46, %v1897_v45 }
 0x105   :  { %v1922_v48 = vpop.f32.mrf.mxu2 }
 0x106   :  { %v1923_v49 = vadd.f32 %v1922_v48, %v1910_v47  ;;  %v1898_v51 = vpop.f32.mrf.mxu0 }
 0x107   :  { %v1935_v50 = vpop.f32.mrf.mxu3 }
 0x108   :  { %v1936_v52 = vadd.f32 %v1935_v50, %v1923_v49  ;;  %v1911_v53 = vpop.f32.mrf.mxu1 }
 0x10d   :  { %v1924_v54 = vpop.f32.mrf.mxu2 }
 0x10f   :  { %v1937_v55 = vpop.f32.mrf.mxu3 }
 0x11e   :  { %v1948_v56 = vpop.f32.mrf.mxu0 }
 0x11f   :  { %v1949_v12 = vadd.f32 %v1948_v56, %v1936_v52 }
 0x120   :  { %v1961_v58 = vpop.f32.mrf.mxu1 }
 0x121   :  { %v1962_v17 = vadd.f32 %v1961_v58, %v1949_v12 }
 0x125   :  { %v1974_v59 = vpop.f32.mrf.mxu2 }
 0x126   :  { %v1950_v62 = vpop.f32.mrf.mxu0  ;;  %v1975_v19 = vadd.f32 %v1974_v59, %v1962_v17 }
 0x127   :  { %v1987_v61 = vpop.f32.mrf.mxu3 }
 0x128   :  { %v1963_v0 = vpop.f32.mrf.mxu1  ;;  %v1988_v23 = vadd.f32 %v1987_v61, %v1975_v19 }
 0x12d   :  { %v1976_v2 = vpop.f32.mrf.mxu2 }
 0x12f   :  { %v1989_v3 = vpop.f32.mrf.mxu3 }
 0x13e   :  { %v2000_v7 = vpop.f32.mrf.mxu0 }
 0x13f   :  { %v2001_v24 = vadd.f32 %v2000_v7, %v1988_v23 }
 0x140   :  { %v2013_v9 = vpop.f32.mrf.mxu1 }
 0x141   :  { %v2014_v26 = vadd.f32 %v2013_v9, %v2001_v24 }
 0x145   :  { %v2026_v10 = vpop.f32.mrf.mxu2 }
 0x146   :  { %v2002_v14 = vpop.f32.mrf.mxu0  ;;  %v2027_v28 = vadd.f32 %v2026_v10, %v2014_v26 }
 0x147   :  { %v2039_v13 = vpop.f32.mrf.mxu3 }
 0x148   :  { %v2015_v16 = vpop.f32.mrf.mxu1  ;;  %v2040_v29 = vadd.f32 %v2039_v13, %v2027_v28 }
 0x14d   :  { %v2028_v20 = vpop.f32.mrf.mxu2 }
 0x14f   :  { %v2041_v21 = vpop.f32.mrf.mxu3 }
 0x15e   :  { %v2052_v30 = vpop.f32.mrf.mxu0 }
 0x15f   :  { %v2053_v31 = vadd.f32 %v2052_v30, %v2040_v29 }
 0x161   :  { %v2056_v32 = vmax.f32 %v2053_v31, 0.0 }
 0x163   :  { %v2057_v33 = vpack.c.bf16 %v2056_v32, %v2056_v32 }
 0x165   :  { %2134 = vmatmul.bf16.vlgmr.msra.gmra.mxu1 %v2057_v33 }
 0x166   :  { %v2054_v34 = vpop.f32.mrf.mxu0 }
 0x1e2   :  { %v2135_v38 = vpop.f32.mrf.mxu1 }
 0x1e3   :  { %v2136_v39 = vadd.f32 %v3308_v37, %v2135_v38 }
 0x1e5   :  { %v2139_v40 = vmax.f32 %v2136_v39, 0.0 }
 0x1e7   :  { %v2140_v41 = vpack.c.bf16 %v2139_v40, %v2139_v40 }
 0x1e9   :  { %2217 = vmatmul.bf16.vlgmr.msra.gmra.mxu2 %v2140_v41 }
 0x1ea   :  { %v2137_v42 = vpop.f32.mrf.mxu1 }
 0x26c   :  { %v2218_v44 = vpop.f32.mrf.mxu2 }
 0x26d   :  { %v2219_v45 = vadd.f32 %v3309_v43, %v2218_v44 }
 0x26f   :  { %2222 = vst [vmem:[%s4056_s7] sm:$0xff] %v2219_v45 }
 0x274   :  { %v2220_v46 = vpop.f32.mrf.mxu2 }

</bundles_post_ra>
